<compile_context>
chip_gen: v5e
topology: v5e:2x2
jax: 0.10.0
libtpu: 0.0.40
codegen_flags: <defaults>
</compile_context>

<pallas_src>
import functools

import jax
import jax.numpy as jnp
from jax import lax
from jax.experimental import pallas as pl
from jax.experimental.pallas import tpu as pltpu

HID_A = 512               # actor hidden size  (nn.Linear(s_dim, 512))
HID_C = 256               # critic hidden size (nn.Linear(s_dim, 256))
HID_T = HID_A + HID_C     # fused trunk width (768)
HEAD_ROWS = 16            # packed [mu | sigma | v | pad] sublane rows
LANE = 128                # TPU lane width


def _softplus(x):
    # numerically stable log(1 + exp(x)), matches F.softplus (beta=1)
    return jnp.maximum(x, 0.0) + jnp.log1p(jnp.exp(-jnp.abs(x)))


def _net_kernel(a_dim,
                xT_ref,              # (s_dim, TB)  f32   batch in lanes
                wtT_ref, btT_ref,    # (768, s_dim) f32 / (768, 1) f32
                whT_ref, bhT_ref,    # (16, 768) bf16   / (16, 1) f32
                out_ref):            # (16, TB)  f32  rows: mu | sigma | v | 0
    xT = xT_ref[...]

    # Fused trunk: actor(512) + critic(256) hiddens in ONE MXU call.
    hT = jnp.dot(wtT_ref[...], xT, preferred_element_type=jnp.float32)
    hT = hT + btT_ref[...]                       # lane-broadcast bias
    hT = jnp.clip(hT, 0.0, 6.0)                  # relu6, (768, TB)

    # Fused heads (mu | sigma | v) in ONE bf16 MXU call -> (16, TB).
    # Rows 0:512 of whT only feed mu/sigma lanes, rows 512:768 only feed the
    # value row, so the shared `hT` input reproduces y / c1 usage exactly.
    pre = jnp.dot(whT_ref[...], hT.astype(whT_ref.dtype),
                  preferred_element_type=jnp.float32)
    pre = pre + bhT_ref[...]

    row = lax.broadcasted_iota(jnp.int32, pre.shape, 0)     # sublane index
    mu = 2.0 * jnp.tanh(pre)                                 # EUP
    sigma = _softplus(pre) + 0.001                           # EUP
    out_ref[...] = jnp.where(
        row < a_dim, mu,
        jnp.where(row < 2 * a_dim, sigma,
                  jnp.where(row == 2 * a_dim, pre, 0.0)))    # row 2a = value


def pack_params(params, head_dtype=jnp.bfloat16):
    """One-time weight packing (call once per parameter set, not per forward)."""
    a_dim = params["w_mu"].shape[1]
    assert 2 * a_dim + 1 <= HEAD_ROWS, "a_dim too large for 16-row packed head"
    f32 = jnp.float32

    # Fused trunk, transposed: (768, s_dim) = [Wa.T ; Wc.T], bias (768, 1).
    wtT = jnp.concatenate([params["w_a"].T, params["w_c"].T], axis=0).astype(f32)
    btT = jnp.concatenate([params["b_a"], params["b_c"]], axis=1
                          ).reshape(HID_T, 1).astype(f32)

    # Fused mu|sigma|v head, transposed + zero padded: (16, 768).
    whT = jnp.zeros((HEAD_ROWS, HID_T), f32)
    whT = whT.at[:a_dim, :HID_A].set(params["w_mu"].T)
    whT = whT.at[a_dim:2 * a_dim, :HID_A].set(params["w_sigma"].T)
    whT = whT.at[2 * a_dim, HID_A:].set(params["w_v"][:, 0])
    bhT = jnp.zeros((HEAD_ROWS, 1), f32)
    bhT = bhT.at[:a_dim, 0].set(params["b_mu"][0])
    bhT = bhT.at[a_dim:2 * a_dim, 0].set(params["b_sigma"][0])
    bhT = bhT.at[2 * a_dim, 0].set(params["b_v"][0, 0])

    return dict(wtT=wtT, btT=btT, whT=whT.astype(head_dtype), bhT=bhT)


def _tile_batch(B, tb):
    """Lane-aligned batch tiling; >=2 grid steps (v7x dual-TC) once Bp > 128."""
    Bp = pl.cdiv(B, LANE) * LANE
    if Bp <= LANE:
        return Bp, Bp                         # single 128-lane tile
    n_tiles = max(2, pl.cdiv(Bp, tb))
    TB = pl.cdiv(pl.cdiv(Bp, n_tiles), LANE) * LANE
    return n_tiles * TB, TB


@functools.partial(jax.jit, static_argnames=("a_dim", "tb"))
def net_forward(x, packed, *, a_dim, tb=1024):
    """x: (B, s_dim) float32. packed: output of pack_params. -> (mu, sigma, v)."""
    B, s_dim = x.shape
    assert tb % LANE == 0 and 2 * a_dim + 1 <= HEAD_ROWS

    Bp, TB = _tile_batch(B, tb)
    if Bp != B:
        x = jnp.pad(x, ((0, Bp - B), (0, 0)))
    xT = x.T                                            # (s_dim, Bp), batch in lanes

    grid = (Bp // TB,)
    resident = lambda i: (0, 0)                         # weights stay VMEM-resident

    cost = pl.CostEstimate(
        flops=2 * Bp * (s_dim * HID_T + HID_T * HEAD_ROWS),
        transcendentals=3 * HEAD_ROWS * Bp,
        bytes_accessed=4 * Bp * (s_dim + HEAD_ROWS)
        + 4 * HID_T * (s_dim + 1) + 2 * HEAD_ROWS * HID_T + 4 * HEAD_ROWS,
    )

    out = pl.pallas_call(
        functools.partial(_net_kernel, a_dim),
        out_shape=jax.ShapeDtypeStruct((HEAD_ROWS, Bp), jnp.float32),
        grid=grid,
        in_specs=[
            pl.BlockSpec((s_dim, TB), lambda i: (0, i)),        # x.T batch tile
            pl.BlockSpec((HID_T, s_dim), resident),             # fused trunk W.T
            pl.BlockSpec((HID_T, 1), resident),                 # fused trunk b
            pl.BlockSpec((HEAD_ROWS, HID_T), resident),         # fused head W.T (bf16)
            pl.BlockSpec((HEAD_ROWS, 1), resident),             # fused head b
        ],
        out_specs=pl.BlockSpec((HEAD_ROWS, TB), lambda i: (0, i)),
        compiler_params=pltpu.CompilerParams(
            dimension_semantics=("parallel",),   # shard batch tiles over TCs (v7x)
            vmem_limit_bytes=32 << 20,           # keep double-buffering on v5e
        ),
        cost_estimate=cost,
    )(xT, packed["wtT"], packed["btT"], packed["whT"], packed["bhT"])

    mu = out[:a_dim, :B].T                              # (B, a_dim)
    sigma = out[a_dim:2 * a_dim, :B].T                  # (B, a_dim)
    v = out[2 * a_dim:2 * a_dim + 1, :B].T              # (B, 1)
    return mu, sigma, v


def init_params(key, s_dim, a_dim):
    """Deterministic synthetic init mimicking set_init (N(0,0.1) weights, zero bias)."""
    ks = jax.random.split(key, 5)

    def lin(k, fan_in, fan_out):
        w = 0.1 * jax.random.normal(k, (fan_in, fan_out), dtype=jnp.float32)
        b = jnp.zeros((1, fan_out), dtype=jnp.float32)
        return w, b

    w_a, b_a = lin(ks[0], s_dim, HID_A)
    w_mu, b_mu = lin(ks[1], HID_A, a_dim)
    w_sigma, b_sigma = lin(ks[2], HID_A, a_dim)
    w_c, b_c = lin(ks[3], s_dim, HID_C)
    w_v, b_v = lin(ks[4], HID_C, 1)
    return dict(w_a=w_a, b_a=b_a, w_mu=w_mu, b_mu=b_mu,
                w_sigma=w_sigma, b_sigma=b_sigma,
                w_c=w_c, b_c=b_c, w_v=w_v, b_v=b_v)


def reference_forward(x, p):
    y = jnp.clip(x @ p["w_a"] + p["b_a"], 0.0, 6.0)
    mu = 2.0 * jnp.tanh(y @ p["w_mu"] + p["b_mu"])
    sigma = jax.nn.softplus(y @ p["w_sigma"] + p["b_sigma"]) + 0.001
    c1 = jnp.clip(x @ p["w_c"] + p["b_c"], 0.0, 6.0)
    v = c1 @ p["w_v"] + p["b_v"]
    return mu, sigma, v


if __name__ == "__main__":
    key = jax.random.PRNGKey(0)
    k_x, k_p = jax.random.split(key)

    B, S_DIM, A_DIM = 8, 16, 4
    x = jax.random.normal(k_x, (B, S_DIM), dtype=jnp.float32)
    params = init_params(k_p, S_DIM, A_DIM)
    packed = pack_params(params)                      # one-time weight packing

    mu, sigma, v = net_forward(x, packed, a_dim=A_DIM)
    jax.block_until_ready((mu, sigma, v))

    mu_r, sigma_r, v_r = reference_forward(x, params)
    assert mu.shape == (B, A_DIM) and sigma.shape == (B, A_DIM) and v.shape == (B, 1)
    # Head matmul runs with bf16 operands (f32 accumulation) -> bf16-level tolerance.
    assert jnp.allclose(mu, mu_r, atol=3e-2, rtol=3e-2)
    assert jnp.allclose(sigma, sigma_r, atol=3e-2, rtol=3e-2)
    assert jnp.allclose(v, v_r, atol=3e-2, rtol=3e-2)

    print("KERNEL_OK")
</pallas_src>

<mosaic_0001>
module attributes {stable_mosaic.version = 11 : i64} {
  func.func @_net_kernel(%arg0: i32, %arg1: memref<16x128xf32, #tpu.memory_space<vmem>>, %arg2: memref<768x16xf32, #tpu.memory_space<vmem>>, %arg3: memref<768x1xf32, #tpu.memory_space<vmem>>, %arg4: memref<16x768xbf16, #tpu.memory_space<vmem>>, %arg5: memref<16x1xf32, #tpu.memory_space<vmem>>, %arg6: memref<16x128xf32, #tpu.memory_space<vmem>>) attributes {dimension_semantics = [#tpu.dimension_semantics<parallel>], iteration_bounds = array<i64: 1>, scalar_prefetch = 0 : i64, scratch_operands = 0 : i64, tpu.core_type = #tpu.core_type<tc>, window_params = [{transform_indices = @transform_0, window_bounds = array<i64: 16, 128>}, {pipeline_mode = #tpu.pipeline_mode<synchronous>, transform_indices = @transform_1, window_bounds = array<i64: 768, 16>}, {pipeline_mode = #tpu.pipeline_mode<synchronous>, transform_indices = @transform_2, window_bounds = array<i64: 768, 1>}, {pipeline_mode = #tpu.pipeline_mode<synchronous>, transform_indices = @transform_3, window_bounds = array<i64: 16, 768>}, {pipeline_mode = #tpu.pipeline_mode<synchronous>, transform_indices = @transform_4, window_bounds = array<i64: 16, 1>}, {transform_indices = @transform_5, window_bounds = array<i64: 16, 128>}]} {
    %c0 = arith.constant 0 : index
    %c0_0 = arith.constant 0 : index
    %0 = vector.load %arg1[%c0, %c0_0] : memref<16x128xf32, #tpu.memory_space<vmem>>, vector<16x128xf32>
    %c0_1 = arith.constant 0 : index
    %c0_2 = arith.constant 0 : index
    %1 = vector.load %arg2[%c0_1, %c0_2] : memref<768x16xf32, #tpu.memory_space<vmem>>, vector<768x16xf32>
    %cst = arith.constant dense<0.000000e+00> : vector<768x128xf32>
    %2 = tpu.matmul %1, %0, %cst {dimension_numbers = #tpu.dot_dimension_numbers<[1], [0], [0], [1], [0, 0, 1, 1], [], []>} : vector<768x16xf32>, vector<16x128xf32>, vector<768x128xf32> -> vector<768x128xf32>
    %c0_3 = arith.constant 0 : index
    %c0_4 = arith.constant 0 : index
    %3 = vector.load %arg3[%c0_3, %c0_4] : memref<768x1xf32, #tpu.memory_space<vmem>>, vector<768x1xf32>
    %4 = vector.broadcast %3 : vector<768x1xf32> to vector<768x128xf32>
    %5 = arith.addf %2, %4 : vector<768x128xf32>
    %cst_5 = arith.constant 0.000000e+00 : f32
    %cst_6 = arith.constant 6.000000e+00 : f32
    %6 = vector.broadcast %cst_5 : f32 to vector<768x128xf32>
    %7 = arith.maximumf %6, %5 : vector<768x128xf32>
    %8 = vector.broadcast %cst_6 : f32 to vector<768x128xf32>
    %9 = arith.minimumf %8, %7 : vector<768x128xf32>
    %c0_7 = arith.constant 0 : index
    %c0_8 = arith.constant 0 : index
    %10 = vector.load %arg4[%c0_7, %c0_8] : memref<16x768xbf16, #tpu.memory_space<vmem>>, vector<16x768xbf16>
    %11 = arith.truncf %9 : vector<768x128xf32> to vector<768x128xbf16>
    %cst_9 = arith.constant dense<0.000000e+00> : vector<16x128xf32>
    %12 = tpu.matmul %10, %11, %cst_9 {dimension_numbers = #tpu.dot_dimension_numbers<[1], [0], [0], [1], [0, 0, 1, 1], [], []>} : vector<16x768xbf16>, vector<768x128xbf16>, vector<16x128xf32> -> vector<16x128xf32>
    %c0_10 = arith.constant 0 : index
    %c0_11 = arith.constant 0 : index
    %13 = vector.load %arg5[%c0_10, %c0_11] : memref<16x1xf32, #tpu.memory_space<vmem>>, vector<16x1xf32>
    %14 = vector.broadcast %13 : vector<16x1xf32> to vector<16x128xf32>
    %15 = arith.addf %12, %14 : vector<16x128xf32>
    %16 = tpu.iota {dimensions = array<i32: 0>} : vector<16x128xi32>
    %17 = math.tanh %15 : vector<16x128xf32>
    %cst_12 = arith.constant 2.000000e+00 : f32
    %18 = vector.broadcast %cst_12 : f32 to vector<16x128xf32>
    %19 = arith.mulf %18, %17 : vector<16x128xf32>
    %cst_13 = arith.constant 0.000000e+00 : f32
    %20 = vector.broadcast %cst_13 : f32 to vector<16x128xf32>
    %21 = arith.maximumf %15, %20 : vector<16x128xf32>
    %22 = math.absf %15 : vector<16x128xf32>
    %cst_14 = arith.constant 0.000000e+00 : f32
    %23 = vector.broadcast %cst_14 : f32 to vector<16x128xf32>
    %24 = arith.subf %23, %22 : vector<16x128xf32>
    %25 = math.exp %24 : vector<16x128xf32>
    %26 = math.log1p %25 : vector<16x128xf32>
    %27 = arith.addf %21, %26 : vector<16x128xf32>
    %cst_15 = arith.constant 1.000000e-03 : f32
    %28 = vector.broadcast %cst_15 : f32 to vector<16x128xf32>
    %29 = arith.addf %27, %28 : vector<16x128xf32>
    %c4_i32 = arith.constant 4 : i32
    %30 = vector.broadcast %c4_i32 : i32 to vector<16x128xi32>
    %31 = arith.cmpi slt, %16, %30 : vector<16x128xi32>
    %c8_i32 = arith.constant 8 : i32
    %32 = vector.broadcast %c8_i32 : i32 to vector<16x128xi32>
    %33 = arith.cmpi slt, %16, %32 : vector<16x128xi32>
    %c8_i32_16 = arith.constant 8 : i32
    %34 = vector.broadcast %c8_i32_16 : i32 to vector<16x128xi32>
    %35 = arith.cmpi eq, %16, %34 : vector<16x128xi32>
    %cst_17 = arith.constant 0.000000e+00 : f32
    %36 = vector.broadcast %cst_17 : f32 to vector<16x128xf32>
    %37 = arith.select %35, %15, %36 : vector<16x128xi1>, vector<16x128xf32>
    %38 = arith.select %33, %29, %37 : vector<16x128xi1>, vector<16x128xf32>
    %39 = arith.select %31, %19, %38 : vector<16x128xi1>, vector<16x128xf32>
    %c0_18 = arith.constant 0 : index
    %c0_19 = arith.constant 0 : index
    %40 = vector.load %arg6[%c0_18, %c0_19] : memref<16x128xf32, #tpu.memory_space<vmem>>, vector<16x128xf32>
    tpu.vector_store %arg6[%c0_18, %c0_19], %39 {strides = array<i32>} : memref<16x128xf32, #tpu.memory_space<vmem>>, vector<16x128xf32>,
    return
  }
  func.func @transform_0(%arg0: i32) -> (i32, i32) {
    %c0_i32 = arith.constant 0 : i32
    %c0_i32_0 = arith.constant 0 : i32
    return %c0_i32, %arg0 : i32, i32
  }
  func.func @transform_1(%arg0: i32) -> (i32, i32) {
    %c0_i32 = arith.constant 0 : i32
    %c0_i32_0 = arith.constant 0 : i32
    %c0_i32_1 = arith.constant 0 : i32
    return %c0_i32, %c0_i32_0 : i32, i32
  }
  func.func @transform_2(%arg0: i32) -> (i32, i32) {
    %c0_i32 = arith.constant 0 : i32
    %c0_i32_0 = arith.constant 0 : i32
    %c0_i32_1 = arith.constant 0 : i32
    return %c0_i32, %c0_i32_0 : i32, i32
  }
  func.func @transform_3(%arg0: i32) -> (i32, i32) {
    %c0_i32 = arith.constant 0 : i32
    %c0_i32_0 = arith.constant 0 : i32
    %c0_i32_1 = arith.constant 0 : i32
    return %c0_i32, %c0_i32_0 : i32, i32
  }
  func.func @transform_4(%arg0: i32) -> (i32, i32) {
    %c0_i32 = arith.constant 0 : i32
    %c0_i32_0 = arith.constant 0 : i32
    %c0_i32_1 = arith.constant 0 : i32
    return %c0_i32, %c0_i32_0 : i32, i32
  }
  func.func @transform_5(%arg0: i32) -> (i32, i32) {
    %c0_i32 = arith.constant 0 : i32
    %c0_i32_0 = arith.constant 0 : i32
    return %c0_i32, %arg0 : i32, i32
  }
}

</mosaic_0001>

<bundles_post_ra>
// kernel: net_forward.1
= control target key start
LH: loop header
LB: loop body
LE: loop exit
PB: predicated region body
PF: predicated region fallthrough
CT: control target
= control target key end

     0   :  { %v1859_v0 = vmov 0   ;;  %vm694_vm0 = vcmask 130048   ;;  %s3147_s2 = inlined_call_operand.vmem [shape: f32[768,1], index: 2, kind: input, shape index: {}]   ;;  %s3148_s0 = inlined_call_operand.vmem [shape: f32[16,128], index: 0, kind: input, shape index: {}]   ;;  %s3149_s1 = inlined_call_operand.vmem [shape: f32[768,16], index: 1, kind: input, shape index: {}]   ;;  %s3150_s4 = inlined_call_operand.vmem [shape: f32[16,1], index: 4, kind: input, shape index: {}]   ;;  %s3151_s3 = inlined_call_operand.vmem [shape: bf16[16,768], index: 3, kind: input, shape index: {}]   ;;  %s3152_s5 = inlined_call_operand.vmem [shape: f32[16,128], index: 5, kind: output, shape index: {}]  }
   0x1   :  { %1852 = vset.pattern.permute.xlu2 %v1859_v0  ;;  %1851 = vset.pattern.permute.xlu1 %v1859_v0  ;;  %v122_v1 = vld [vmem:[%s3147_s2 + $0x20] sm:$0xff]  ;;  %v120_v2 = vld [vmem:[%s3147_s2 + $0x10] sm:$0xff]  ;;  %v21_v4 = vld [vmem:[%s3148_s0 + $0x8] sm:$0xff] }
   0x2   :  { %v118_v3 = vld [vmem:[%s3147_s2] sm:$0xff]  ;;  %1850 = vset.pattern.permute.xlu0 %v1859_v0  ;;  %236 = vperm.xlu2 %1852, %v122_v1   ;;  %v53_v7 = vld [vmem:[%s3149_s1 + $0xf8] sm:$0xff]  ;;  %v123_v9 = vld [vmem:[%s3147_s2 + $0x28] sm:$0xff] }
   0x3   :  { %226 = vperm.xlu1 %1851, %v120_v2   ;;  %216 = vperm.xlu0 %1850, %v118_v3   ;;  %v20_v5 = vld [vmem:[%s3148_s0] sm:$0xff]  ;;  %v77_v8 = vld [vmem:[%s3149_s1 + $0x1b8] sm:$0xff]  ;;  %v100_v10 = vld [vmem:[%s3149_s1 + $0x270] sm:$0xff] }
   0x4   :  { %997 = vmatpush.msra.mxu0 %v21_v4  ;;  %1843 = vmatpush.msra.mxu1 %v21_v4  ;;  %v22_v6 = vld [vmem:[%s3149_s1] sm:$0xff]  ;;  %v121_v11 = vld [vmem:[%s3147_s2 + $0x18] sm:$0xff]  ;;  %v119_v12 = vld [vmem:[%s3147_s2 + $0x8] sm:$0xff] }
   0x5   :  { %1844 = vmatpush.msra.mxu2 %v21_v4  ;;  %1845 = vmatpush.msra.mxu3 %v21_v4  ;;  %v23_v13 = vld [vmem:[%s3149_s1 + $0x8] sm:$0xff]  ;;  %v54_v14 = vld [vmem:[%s3149_s1 + $0x100] sm:$0xff]  ;;  %v101_v17 = vld [vmem:[%s3149_s1 + $0x278] sm:$0xff] }
   0x6   :  { %998 = vmatpush.msra.mxu0 %v20_v5  ;;  %1846 = vmatpush.msra.mxu1 %v20_v5  ;;  %v78_v15 = vld [vmem:[%s3149_s1 + $0x1c0] sm:$0xff]  ;;  %v125_v18 = vld [vmem:[%s3147_s2 + $0x38] sm:$0xff]  ;;  %v124_v19 = vld [vmem:[%s3147_s2 + $0x30] sm:$0xff] }
   0x7   :  { %1847 = vmatpush.msra.mxu2 %v20_v5  ;;  %1717 = vmatmul.msk.f32.vlgmr.msra.gmra.mxu0 %vm694_vm0, %v22_v6  ;;  %v126_v16 = vld [vmem:[%s3147_s2 + $0x40] sm:$0xff]  ;;  %v24_v20 = vld [vmem:[%s3149_s1 + $0x10] sm:$0xff]  ;;  %v55_v21 = vld [vmem:[%s3149_s1 + $0x108] sm:$0xff] }
   0x8   :  { %1748 = vmatmul.msk.f32.vlgmr.msra.gmra.mxu1 %vm694_vm0, %v53_v7  ;;  %1772 = vmatmul.msk.f32.vlgmr.msra.gmra.mxu2 %vm694_vm0, %v77_v8  ;;  %v79_v22 = vld [vmem:[%s3149_s1 + $0x1c8] sm:$0xff]  ;;  %v129_v23 = vld [vmem:[%s3147_s2 + $0x58] sm:$0xff]  ;;  %v102_v24 = vld [vmem:[%s3149_s1 + $0x280] sm:$0xff] }
   0x9   :  { %1848 = vmatpush.msra.mxu3 %v20_v5  ;;  %v128_v25 = vld [vmem:[%s3147_s2 + $0x50] sm:$0xff]  ;;  %v127_v26 = vld [vmem:[%s3147_s2 + $0x48] sm:$0xff]  ;;  %v25_v27 = vld [vmem:[%s3149_s1 + $0x18] sm:$0xff] }
   0xa   :  { %241 = vperm.xlu2 %1852, %v123_v9   ;;  %1795 = vmatmul.msk.f32.vlgmr.msra.gmra.mxu3 %vm694_vm0, %v100_v10  ;;  %v56_v28 = vld [vmem:[%s3149_s1 + $0x110] sm:$0xff]  ;;  %v103_v31 = vld [vmem:[%s3149_s1 + $0x288] sm:$0xff]  ;;  %v130_v33 = vld [vmem:[%s3147_s2 + $0x60] sm:$0xff] }
   0xb   :  { %231 = vperm.xlu1 %1851, %v121_v11   ;;  %221 = vperm.xlu0 %1850, %v119_v12   ;;  %v80_v29 = vld [vmem:[%s3149_s1 + $0x1d0] sm:$0xff]  ;;  %v131_v32 = vld [vmem:[%s3147_s2 + $0x68] sm:$0xff]  ;;  %v26_v34 = vld [vmem:[%s3149_s1 + $0x20] sm:$0xff] }
   0xc   :  { %v132_v30 = vld [vmem:[%s3147_s2 + $0x70] sm:$0xff]  ;;  %v57_v35 = vld [vmem:[%s3149_s1 + $0x118] sm:$0xff]  ;;  %v135_v37 = vld [vmem:[%s3147_s2 + $0x88] sm:$0xff] }
   0xd   :  { %v81_v36 = vld [vmem:[%s3149_s1 + $0x1d8] sm:$0xff]  ;;  %v104_v38 = vld [vmem:[%s3149_s1 + $0x290] sm:$0xff]  ;;  %v134_v39 = vld [vmem:[%s3147_s2 + $0x80] sm:$0xff] }
   0xe   :  { %v133_v40 = vld [vmem:[%s3147_s2 + $0x78] sm:$0xff]  ;;  %v27_v41 = vld [vmem:[%s3149_s1 + $0x28] sm:$0xff]  ;;  %v58_v42 = vld [vmem:[%s3149_s1 + $0x120] sm:$0xff] }
   0xf   :  { %1718 = vmatmul.msk.f32.gmra.mxu0 %vm694_vm0, %v23_v13  ;;  %v82_v43 = vld [vmem:[%s3149_s1 + $0x1e0] sm:$0xff]  ;;  %v105_v45 = vld [vmem:[%s3149_s1 + $0x298] sm:$0xff]  ;;  %v136_v47 = vld [vmem:[%s3147_s2 + $0x90] sm:$0xff] }
  0x10   :  { %1749 = vmatmul.msk.f32.gmra.mxu1 %vm694_vm0, %v54_v14  ;;  %1773 = vmatmul.msk.f32.gmra.mxu2 %vm694_vm0, %v78_v15  ;;  %v138_v44 = vld [vmem:[%s3147_s2 + $0xa0] sm:$0xff]  ;;  %v137_v46 = vld [vmem:[%s3147_s2 + $0x98] sm:$0xff]  ;;  %v28_v48 = vld [vmem:[%s3149_s1 + $0x30] sm:$0xff] }
  0x11   :  { %v59_v49 = vld [vmem:[%s3149_s1 + $0x128] sm:$0xff]  ;;  %v141_v51 = vld [vmem:[%s3147_s2 + $0xb8] sm:$0xff]  ;;  %v106_v52 = vld [vmem:[%s3149_s1 + $0x2a0] sm:$0xff] }
  0x12   :  { %256 = vperm.xlu2 %1852, %v126_v16   ;;  %1796 = vmatmul.msk.f32.gmra.mxu3 %vm694_vm0, %v101_v17  ;;  %v83_v50 = vld [vmem:[%s3149_s1 + $0x1e8] sm:$0xff]  ;;  %v140_v53 = vld [vmem:[%s3147_s2 + $0xb0] sm:$0xff]  ;;  %v29_v55 = vld [vmem:[%s3149_s1 + $0x38] sm:$0xff] }
  0x13   :  { %251 = vperm.xlu1 %1851, %v125_v18   ;;  %246 = vperm.xlu0 %1850, %v124_v19   ;;  %v139_v54 = vld [vmem:[%s3147_s2 + $0xa8] sm:$0xff]  ;;  %v60_v56 = vld [vmem:[%s3149_s1 + $0x130] sm:$0xff]  ;;  %v142_v61 = vld [vmem:[%s3147_s2 + $0xc0] sm:$0xff] }
  0x14   :  { %v84_v57 = vld [vmem:[%s3149_s1 + $0x1f0] sm:$0xff]  ;;  %v107_v59 = vld [vmem:[%s3149_s1 + $0x2a8] sm:$0xff]  ;;  %v30_v62 = vld [vmem:[%s3149_s1 + $0x40] sm:$0xff] }
  0x15   :  { %v144_v58 = vld [vmem:[%s3147_s2 + $0xd0] sm:$0xff]  ;;  %v143_v60 = vld [vmem:[%s3147_s2 + $0xc8] sm:$0xff]  ;;  %v61_v63 = vld [vmem:[%s3149_s1 + $0x138] sm:$0xff] }
  0x16   :  { %v85_v0 = vld [vmem:[%s3149_s1 + $0x1f8] sm:$0xff]  ;;  %v147_v1 = vld [vmem:[%s3147_s2 + $0xe8] sm:$0xff]  ;;  %v108_v2 = vld [vmem:[%s3149_s1 + $0x2b0] sm:$0xff] }
  0x17   :  { %1719 = vmatmul.msk.f32.gmra.mxu0 %vm694_vm0, %v24_v20  ;;  %v146_v3 = vld [vmem:[%s3147_s2 + $0xe0] sm:$0xff]  ;;  %v145_v4 = vld [vmem:[%s3147_s2 + $0xd8] sm:$0xff]  ;;  %v31_v5 = vld [vmem:[%s3149_s1 + $0x48] sm:$0xff] }
  0x18   :  { %1750 = vmatmul.msk.f32.gmra.mxu1 %vm694_vm0, %v55_v21  ;;  %1774 = vmatmul.msk.f32.gmra.mxu2 %vm694_vm0, %v79_v22  ;;  %v62_v6 = vld [vmem:[%s3149_s1 + $0x140] sm:$0xff]  ;;  %v109_v9 = vld [vmem:[%s3149_s1 + $0x2b8] sm:$0xff]  ;;  %v148_v11 = vld [vmem:[%s3147_s2 + $0xf0] sm:$0xff] }
  0x19   :  { %v86_v7 = vld [vmem:[%s3149_s1 + $0x200] sm:$0xff]  ;;  %v149_v10 = vld [vmem:[%s3147_s2 + $0xf8] sm:$0xff]  ;;  %v32_v12 = vld [vmem:[%s3149_s1 + $0x50] sm:$0xff] }
  0x1a   :  { %271 = vperm.xlu2 %1852, %v129_v23   ;;  %1797 = vmatmul.msk.f32.gmra.mxu3 %vm694_vm0, %v102_v24  ;;  %v150_v8 = vld [vmem:[%s3147_s2 + $0x100] sm:$0xff]  ;;  %v63_v13 = vld [vmem:[%s3149_s1 + $0x148] sm:$0xff]  ;;  %v153_v15 = vld [vmem:[%s3147_s2 + $0x118] sm:$0xff] }
  0x1b   :  { %266 = vperm.xlu1 %1851, %v128_v25   ;;  %261 = vperm.xlu0 %1850, %v127_v26   ;;  %v87_v14 = vld [vmem:[%s3149_s1 + $0x208] sm:$0xff]  ;;  %v110_v16 = vld [vmem:[%s3149_s1 + $0x2c0] sm:$0xff]  ;;  %v152_v17 = vld [vmem:[%s3147_s2 + $0x110] sm:$0xff] }
  0x1c   :  { %v151_v18 = vld [vmem:[%s3147_s2 + $0x108] sm:$0xff]  ;;  %v33_v20 = vld [vmem:[%s3149_s1 + $0x58] sm:$0xff]  ;;  %v64_v21 = vld [vmem:[%s3149_s1 + $0x150] sm:$0xff] }
  0x1d   :  { %v88_v22 = vld [vmem:[%s3149_s1 + $0x210] sm:$0xff]  ;;  %v111_v24 = vld [vmem:[%s3149_s1 + $0x2c8] sm:$0xff]  ;;  %v154_v26 = vld [vmem:[%s3147_s2 + $0x120] sm:$0xff] }
  0x1e   :  { %v156_v23 = vld [vmem:[%s3147_s2 + $0x130] sm:$0xff]  ;;  %v155_v25 = vld [vmem:[%s3147_s2 + $0x128] sm:$0xff] }
  0x1f   :  { %1720 = vmatmul.msk.f32.gmra.mxu0 %vm694_vm0, %v25_v27 }
  0x20   :  { %1751 = vmatmul.msk.f32.gmra.mxu1 %vm694_vm0, %v56_v28  ;;  %1775 = vmatmul.msk.f32.gmra.mxu2 %vm694_vm0, %v80_v29  ;;  %v34_v28 = vld [vmem:[%s3149_s1 + $0x60] sm:$0xff]  ;;  %v65_v29 = vld [vmem:[%s3149_s1 + $0x158] sm:$0xff] }
  0x22   :  { %286 = vperm.xlu2 %1852, %v132_v30   ;;  %1798 = vmatmul.msk.f32.gmra.mxu3 %vm694_vm0, %v103_v31  ;;  %v89_v30 = vld [vmem:[%s3149_s1 + $0x218] sm:$0xff]  ;;  %v159_v31 = vld [vmem:[%s3147_s2 + $0x148] sm:$0xff] }
  0x23   :  { %281 = vperm.xlu1 %1851, %v131_v32   ;;  %276 = vperm.xlu0 %1850, %v130_v33   ;;  %v112_v32 = vld [vmem:[%s3149_s1 + $0x2d0] sm:$0xff]  ;;  %v158_v33 = vld [vmem:[%s3147_s2 + $0x140] sm:$0xff] }
  0x27   :  { %1721 = vmatmul.msk.f32.gmra.mxu0 %vm694_vm0, %v26_v34  ;;  %v157_v34 = vld [vmem:[%s3147_s2 + $0x138] sm:$0xff] }
  0x28   :  { %1752 = vmatmul.msk.f32.gmra.mxu1 %vm694_vm0, %v57_v35  ;;  %1776 = vmatmul.msk.f32.gmra.mxu2 %vm694_vm0, %v81_v36  ;;  %v35_v36 = vld [vmem:[%s3149_s1 + $0x68] sm:$0xff] }
  0x2a   :  { %301 = vperm.xlu2 %1852, %v135_v37   ;;  %1799 = vmatmul.msk.f32.gmra.mxu3 %vm694_vm0, %v104_v38  ;;  %v66_v37 = vld [vmem:[%s3149_s1 + $0x160] sm:$0xff] }
  0x2b   :  { %296 = vperm.xlu1 %1851, %v134_v39   ;;  %291 = vperm.xlu0 %1850, %v133_v40   ;;  %v90_v38 = vld [vmem:[%s3149_s1 + $0x220] sm:$0xff]  ;;  %v113_v40 = vld [vmem:[%s3149_s1 + $0x2d8] sm:$0xff] }
  0x2c   :  { %v162_v39 = vld [vmem:[%s3147_s2 + $0x160] sm:$0xff] }
  0x2f   :  { %1722 = vmatmul.msk.f32.gmra.mxu0 %vm694_vm0, %v27_v41  ;;  %v161_v41 = vld [vmem:[%s3147_s2 + $0x158] sm:$0xff] }
  0x30   :  { %1753 = vmatmul.msk.f32.gmra.mxu1 %vm694_vm0, %v58_v42  ;;  %1777 = vmatmul.msk.f32.gmra.mxu2 %vm694_vm0, %v82_v43  ;;  %v160_v42 = vld [vmem:[%s3147_s2 + $0x150] sm:$0xff] }
  0x32   :  { %316 = vperm.xlu2 %1852, %v138_v44   ;;  %1800 = vmatmul.msk.f32.gmra.mxu3 %vm694_vm0, %v105_v45  ;;  %v36_v44 = vld [vmem:[%s3149_s1 + $0x70] sm:$0xff] }
  0x33   :  { %311 = vperm.xlu1 %1851, %v137_v46   ;;  %306 = vperm.xlu0 %1850, %v136_v47   ;;  %v67_v47 = vld [vmem:[%s3149_s1 + $0x168] sm:$0xff] }
  0x37   :  { %1723 = vmatmul.msk.f32.gmra.mxu0 %vm694_vm0, %v28_v48  ;;  %v91_v48 = vld [vmem:[%s3149_s1 + $0x228] sm:$0xff] }
  0x38   :  { %1754 = vmatmul.msk.f32.gmra.mxu1 %vm694_vm0, %v59_v49  ;;  %1778 = vmatmul.msk.f32.gmra.mxu2 %vm694_vm0, %v83_v50  ;;  %v165_v49 = vld [vmem:[%s3147_s2 + $0x178] sm:$0xff]  ;;  %v114_v50 = vld [vmem:[%s3149_s1 + $0x2e0] sm:$0xff] }
  0x3a   :  { %331 = vperm.xlu2 %1852, %v141_v51   ;;  %1801 = vmatmul.msk.f32.gmra.mxu3 %vm694_vm0, %v106_v52  ;;  %v164_v51 = vld [vmem:[%s3147_s2 + $0x170] sm:$0xff]  ;;  %v163_v52 = vld [vmem:[%s3147_s2 + $0x168] sm:$0xff] }
  0x3b   :  { %326 = vperm.xlu1 %1851, %v140_v53   ;;  %321 = vperm.xlu0 %1850, %v139_v54   ;;  %v37_v54 = vld [vmem:[%s3149_s1 + $0x78] sm:$0xff] }
  0x3f   :  { %1724 = vmatmul.msk.f32.gmra.mxu0 %vm694_vm0, %v29_v55 }
  0x40   :  { %1755 = vmatmul.msk.f32.gmra.mxu1 %vm694_vm0, %v60_v56  ;;  %1779 = vmatmul.msk.f32.gmra.mxu2 %vm694_vm0, %v84_v57  ;;  %v68_v57 = vld [vmem:[%s3149_s1 + $0x170] sm:$0xff] }
  0x42   :  { %346 = vperm.xlu2 %1852, %v144_v58   ;;  %1802 = vmatmul.msk.f32.gmra.mxu3 %vm694_vm0, %v107_v59  ;;  %v92_v58 = vld [vmem:[%s3149_s1 + $0x230] sm:$0xff] }
  0x43   :  { %341 = vperm.xlu1 %1851, %v143_v60   ;;  %336 = vperm.xlu0 %1850, %v142_v61   ;;  %v168_v59 = vld [vmem:[%s3147_s2 + $0x190] sm:$0xff]  ;;  %v115_v60 = vld [vmem:[%s3149_s1 + $0x2e8] sm:$0xff] }
  0x44   :  { %v167_v61 = vld [vmem:[%s3147_s2 + $0x188] sm:$0xff] }
  0x47   :  { %1725 = vmatmul.msk.f32.gmra.mxu0 %vm694_vm0, %v30_v62  ;;  %v166_v62 = vld [vmem:[%s3147_s2 + $0x180] sm:$0xff] }
  0x48   :  { %1756 = vmatmul.msk.f32.gmra.mxu1 %vm694_vm0, %v61_v63  ;;  %1780 = vmatmul.msk.f32.gmra.mxu2 %vm694_vm0, %v85_v0 }
  0x4a   :  { %361 = vperm.xlu2 %1852, %v147_v1   ;;  %1803 = vmatmul.msk.f32.gmra.mxu3 %vm694_vm0, %v108_v2  ;;  %v38_v1 = vld [vmem:[%s3149_s1 + $0x80] sm:$0xff] }
  0x4b   :  { %356 = vperm.xlu1 %1851, %v146_v3   ;;  %351 = vperm.xlu0 %1850, %v145_v4   ;;  %v69_v4 = vld [vmem:[%s3149_s1 + $0x178] sm:$0xff] }
  0x4f   :  { %1726 = vmatmul.msk.f32.gmra.mxu0 %vm694_vm0, %v31_v5  ;;  %v93_v5 = vld [vmem:[%s3149_s1 + $0x238] sm:$0xff] }
  0x50   :  { %1757 = vmatmul.msk.f32.gmra.mxu1 %vm694_vm0, %v62_v6  ;;  %1781 = vmatmul.msk.f32.gmra.mxu2 %vm694_vm0, %v86_v7  ;;  %v171_v7 = vld [vmem:[%s3147_s2 + $0x1a8] sm:$0xff] }
  0x52   :  { %376 = vperm.xlu2 %1852, %v150_v8   ;;  %1804 = vmatmul.msk.f32.gmra.mxu3 %vm694_vm0, %v109_v9  ;;  %v116_v8 = vld [vmem:[%s3149_s1 + $0x2f0] sm:$0xff]  ;;  %v170_v9 = vld [vmem:[%s3147_s2 + $0x1a0] sm:$0xff] }
  0x53   :  { %371 = vperm.xlu1 %1851, %v149_v10   ;;  %366 = vperm.xlu0 %1850, %v148_v11   ;;  %v169_v10 = vld [vmem:[%s3147_s2 + $0x198] sm:$0xff] }
  0x57   :  { %1727 = vmatmul.msk.f32.gmra.mxu0 %vm694_vm0, %v32_v12 }
  0x58   :  { %1758 = vmatmul.msk.f32.gmra.mxu1 %vm694_vm0, %v63_v13  ;;  %1782 = vmatmul.msk.f32.gmra.mxu2 %vm694_vm0, %v87_v14 }
  0x5a   :  { %391 = vperm.xlu2 %1852, %v153_v15   ;;  %1805 = vmatmul.msk.f32.gmra.mxu3 %vm694_vm0, %v110_v16  ;;  %v39_v15 = vld [vmem:[%s3149_s1 + $0x88] sm:$0xff] }
  0x5b   :  { %386 = vperm.xlu1 %1851, %v152_v17   ;;  %381 = vperm.xlu0 %1850, %v151_v18  }
  0x5c   :  { %v2180_v19 = vpop.permute.xlu2 %236 }
  0x5f   :  { %1728 = vmatmul.msk.f32.gmra.mxu0 %vm694_vm0, %v33_v20 }
  0x60   :  { %1759 = vmatmul.msk.f32.gmra.mxu1 %vm694_vm0, %v64_v21  ;;  %1783 = vmatmul.msk.f32.gmra.mxu2 %vm694_vm0, %v88_v22  ;;  %v70_v21 = vld [vmem:[%s3149_s1 + $0x180] sm:$0xff] }
  0x61   :  { %v94_v22 = vld [vmem:[%s3149_s1 + $0x240] sm:$0xff] }
  0x62   :  { %406 = vperm.xlu2 %1852, %v156_v23   ;;  %1806 = vmatmul.msk.f32.gmra.mxu3 %vm694_vm0, %v111_v24 }
  0x63   :  { %401 = vperm.xlu1 %1851, %v155_v25   ;;  %396 = vperm.xlu0 %1850, %v154_v26   ;;  %v174_v26 = vld [vmem:[%s3147_s2 + $0x1c0] sm:$0xff] }
  0x64   :  { %v2207_v27 = vpop.permute.xlu2 %241 }
  0x67   :  { %1729 = vmatmul.msk.f32.gmra.mxu0 %vm694_vm0, %v34_v28  ;;  %v117_v28 = vld [vmem:[%s3149_s1 + $0x2f8] sm:$0xff] }
  0x68   :  { %1760 = vmatmul.msk.f32.gmra.mxu1 %vm694_vm0, %v65_v29  ;;  %1784 = vmatmul.msk.f32.gmra.mxu2 %vm694_vm0, %v89_v30  ;;  %v173_v29 = vld [vmem:[%s3147_s2 + $0x1b8] sm:$0xff]  ;;  %v172_v30 = vld [vmem:[%s3147_s2 + $0x1b0] sm:$0xff] }
  0x6a   :  { %421 = vperm.xlu2 %1852, %v159_v31   ;;  %1807 = vmatmul.msk.f32.gmra.mxu3 %vm694_vm0, %v112_v32 }
  0x6b   :  { %416 = vperm.xlu1 %1851, %v158_v33   ;;  %411 = vperm.xlu0 %1850, %v157_v34  }
  0x6c   :  { %v2234_v35 = vpop.permute.xlu2 %256 }
  0x6f   :  { %1730 = vmatmul.msk.f32.gmra.mxu0 %vm694_vm0, %v35_v36 }
  0x70   :  { %1761 = vmatmul.msk.f32.gmra.mxu1 %vm694_vm0, %v66_v37  ;;  %1785 = vmatmul.msk.f32.gmra.mxu2 %vm694_vm0, %v90_v38  ;;  %v40_v38 = vld [vmem:[%s3149_s1 + $0x90] sm:$0xff] }
  0x72   :  { %436 = vperm.xlu2 %1852, %v162_v39   ;;  %1808 = vmatmul.msk.f32.gmra.mxu3 %vm694_vm0, %v113_v40 }
  0x73   :  { %431 = vperm.xlu1 %1851, %v161_v41   ;;  %426 = vperm.xlu0 %1850, %v160_v42   ;;  %v71_v41 = vld [vmem:[%s3149_s1 + $0x188] sm:$0xff] }
  0x74   :  { %v2261_v43 = vpop.permute.xlu2 %271  ;;  %v95_v42 = vld [vmem:[%s3149_s1 + $0x248] sm:$0xff] }
  0x75   :  { %v2266_v45 = vpop.permute.xlu1 %226  ;;  %v217_v46 = vpop.permute.xlu0 %216 }
  0x77   :  { %1731 = vmatmul.msk.f32.gmra.mxu0 %vm694_vm0, %v36_v44 }
  0x78   :  { %1762 = vmatmul.msk.f32.gmra.mxu1 %vm694_vm0, %v67_v47  ;;  %1786 = vmatmul.msk.f32.gmra.mxu2 %vm694_vm0, %v91_v48  ;;  %v197_v47 = vld [vmem:[%s3147_s2 + $0x278] sm:$0xff]  ;;  %v196_v48 = vld [vmem:[%s3147_s2 + $0x270] sm:$0xff] }
  0x7a   :  { %451 = vperm.xlu2 %1852, %v165_v49   ;;  %1809 = vmatmul.msk.f32.gmra.mxu3 %vm694_vm0, %v114_v50  ;;  %v175_v49 = vld [vmem:[%s3147_s2 + $0x1c8] sm:$0xff] }
  0x7b   :  { %446 = vperm.xlu1 %1851, %v164_v51   ;;  %441 = vperm.xlu0 %1850, %v163_v52  }
  0x7c   :  { %v2290_v53 = vpop.permute.xlu2 %286 }
  0x7d   :  { %v2295_v55 = vpop.permute.xlu1 %231  ;;  %v222_v56 = vpop.permute.xlu0 %221 }
  0x7f   :  { %1732 = vmatmul.msk.f32.gmra.mxu0 %vm694_vm0, %v37_v54 }
  0x80   :  { %1763 = vmatmul.msk.f32.gmra.mxu1 %vm694_vm0, %v68_v57  ;;  %1787 = vmatmul.msk.f32.gmra.mxu2 %vm694_vm0, %v92_v58 }
  0x82   :  { %466 = vperm.xlu2 %1852, %v168_v59   ;;  %1810 = vmatmul.msk.f32.gmra.mxu3 %vm694_vm0, %v115_v60 }
  0x83   :  { %461 = vperm.xlu1 %1851, %v167_v61   ;;  %456 = vperm.xlu0 %1850, %v166_v62   ;;  %v96_v61 = vld [vmem:[%s3149_s1 + $0x250] sm:$0xff] }
  0x84   :  { %v1000_v63 = vpop.f32.mrf.mxu0  ;;  %v2319_v0 = vpop.permute.xlu2 %301 }
  0x85   :  { %v2324_v2 = vpop.f32.mrf.mxu1  ;;  %v2326_v3 = vpop.permute.xlu1 %251  ;;  %v1001_v11 = vadd.f32 %v1000_v63, %v217_v46 }
  0x86   :  { %v2334_v6 = vpop.permute.xlu0 %246 }
  0x87   :  { %1733 = vmatmul.msk.f32.gmra.mxu0 %vm694_vm0, %v38_v1  ;;  %v1288_v16 = vmax.f32 %v1001_v11, 0.0 }
  0x88   :  { %1764 = vmatmul.msk.f32.gmra.mxu1 %vm694_vm0, %v69_v4  ;;  %1788 = vmatmul.msk.f32.gmra.mxu2 %vm694_vm0, %v93_v5  ;;  %v213_v4 = vld [vmem:[%s3147_s2 + $0x2f8] sm:$0xff]  ;;  %v212_v5 = vld [vmem:[%s3147_s2 + $0x2f0] sm:$0xff] }
  0x89   :  { %v2388_v31 = vmin.f32 %v1288_v16, 6.0 }
  0x8a   :  { %481 = vperm.xlu2 %1852, %v171_v7   ;;  %1811 = vmatmul.msk.f32.gmra.mxu3 %vm694_vm0, %v116_v8 }
  0x8b   :  { %v2352_v12 = vpop.f32.mrf.mxu2  ;;  %476 = vperm.xlu1 %1851, %v170_v9   ;;  %471 = vperm.xlu0 %1850, %v169_v10   ;;  %3162 = vst [vmem:[#allocation4_spill] sm:$0xff] %v2388_v31 }
  0x8c   :  { %3160 = vst [vmem:[#allocation2_spill] sm:$0xff] %v2352_v12  ;;  %v1003_v13 = vpop.f32.mrf.mxu0  ;;  %v2354_v14 = vpop.permute.xlu2 %316 }
  0x8d   :  { %3161 = vst [vmem:[#allocation3_spill] sm:$0xff] %v2354_v14  ;;  %v1004_v17 = vadd.f32 %v1003_v13, %v222_v56  ;;  %v2359_v18 = vpop.f32.mrf.mxu1  ;;  %v2361_v20 = vpop.permute.xlu1 %266  ;;  %v41_v56 = vld [vmem:[%s3149_s1 + $0x98] sm:$0xff] }
  0x8e   :  { %v2369_v23 = vpop.permute.xlu0 %261  ;;  %v2371_v24 = vpop.f32.mrf.mxu3 }
  0x8f   :  { %v1289_v25 = vmax.f32 %v1004_v17, 0.0  ;;  %1734 = vmatmul.msk.f32.gmra.mxu0 %vm694_vm0, %v39_v15  ;;  %v42_v15 = vld [vmem:[%s3149_s1 + $0xa0] sm:$0xff] }
  0x90   :  { %1765 = vmatmul.msk.f32.gmra.mxu1 %vm694_vm0, %v70_v21  ;;  %1789 = vmatmul.msk.f32.gmra.mxu2 %vm694_vm0, %v94_v22  ;;  %v73_v21 = vld [vmem:[%s3149_s1 + $0x198] sm:$0xff] }
  0x91   :  { %v2390_v32 = vmin.f32 %v1289_v25, 6.0  ;;  %v97_v22 = vld [vmem:[%s3149_s1 + $0x258] sm:$0xff] }
  0x92   :  { %496 = vperm.xlu2 %1852, %v174_v26   ;;  %1812 = vmatmul.msk.f32.gmra.mxu3 %vm694_vm0, %v117_v28  ;;  %v195_v28 = vld [vmem:[%s3147_s2 + $0x268] sm:$0xff] }
  0x93   :  { %v2393_v33 = vpop.f32.mrf.mxu2  ;;  %491 = vperm.xlu1 %1851, %v173_v29   ;;  %486 = vperm.xlu0 %1850, %v172_v30   ;;  %v194_v29 = vld [vmem:[%s3147_s2 + $0x260] sm:$0xff]  ;;  %v181_v30 = vld [vmem:[%s3147_s2 + $0x1f8] sm:$0xff] }
  0x94   :  { %3163 = vst [vmem:[#allocation5_spill] sm:$0xff] %v2393_v33  ;;  %v1006_v36 = vpop.f32.mrf.mxu0  ;;  %v2397_v37 = vpop.permute.xlu2 %331 }
  0x95   :  { %3164 = vst [vmem:[#allocation6_spill] sm:$0xff] %v2397_v37  ;;  %v2402_v39 = vpop.f32.mrf.mxu1  ;;  %v2404_v40 = vpop.permute.xlu1 %281  ;;  %v1007_v50 = vadd.f32 %v1006_v36, %v2266_v45  ;;  %v72_v45 = vld [vmem:[%s3149_s1 + $0x190] sm:$0xff] }
  0x96   :  { %v2412_v44 = vpop.permute.xlu0 %276  ;;  %v2414_v46 = vpop.f32.mrf.mxu3 }
  0x97   :  { %1735 = vmatmul.msk.f32.gmra.mxu0 %vm694_vm0, %v40_v38  ;;  %v1290_v57 = vmax.f32 %v1007_v50, 0.0  ;;  %v98_v50 = vld [vmem:[%s3149_s1 + $0x260] sm:$0xff] }
  0x98   :  { %1766 = vmatmul.msk.f32.gmra.mxu1 %vm694_vm0, %v71_v41  ;;  %1790 = vmatmul.msk.f32.gmra.mxu2 %vm694_vm0, %v95_v42  ;;  %v43_v42 = vld [vmem:[%s3149_s1 + $0xa8] sm:$0xff] }
  0x99   :  { %v2463_v7 = vmin.f32 %v1290_v57, 6.0  ;;  %v178_v57 = vld [vmem:[%s3147_s2 + $0x1e0] sm:$0xff] }
  0x9a   :  { %611 = vperm.xlu2 %1852, %v197_v47  }
  0x9b   :  { %v2429_v51 = vpop.f32.mrf.mxu2  ;;  %606 = vperm.xlu1 %1851, %v196_v48   ;;  %501 = vperm.xlu0 %1850, %v175_v49   ;;  %v74_v49 = vld [vmem:[%s3149_s1 + $0x1a0] sm:$0xff] }
  0x9c   :  { %3165 = vst [vmem:[#allocation7_spill] sm:$0xff] %v2429_v51  ;;  %v1009_v52 = vpop.f32.mrf.mxu0  ;;  %v2431_v54 = vpop.permute.xlu2 %346 }
  0x9d   :  { %3166 = vst [vmem:[#allocation8_spill] sm:$0xff] %v2431_v54  ;;  %v1010_v58 = vadd.f32 %v1009_v52, %v2295_v55  ;;  %v2437_v59 = vpop.f32.mrf.mxu1  ;;  %v2439_v60 = vpop.permute.xlu1 %296  ;;  %v180_v55 = vld [vmem:[%s3147_s2 + $0x1f0] sm:$0xff]  ;;  %v177_v54 = vld [vmem:[%s3147_s2 + $0x1d8] sm:$0xff] }
  0x9e   :  { %v2447_v62 = vpop.permute.xlu0 %291  ;;  %v2449_v63 = vpop.f32.mrf.mxu3 }
  0x9f   :  { %3167 = vst [vmem:[#allocation9_spill] sm:$0xff] %v2449_v63  ;;  %v1291_v1 = vmax.f32 %v1010_v58, 0.0  ;;  %1736 = vmatmul.msk.f32.gmra.mxu0 %vm694_vm0, %v41_v56  ;;  %v211_v58 = vld [vmem:[%s3147_s2 + $0x2e8] sm:$0xff] }
  0xa0   :  { %1767 = vmatmul.msk.f32.gmra.mxu1 %vm694_vm0, %v72_v45  ;;  %1791 = vmatmul.msk.f32.gmra.mxu2 %vm694_vm0, %v96_v61  ;;  %v210_v45 = vld [vmem:[%s3147_s2 + $0x2e0] sm:$0xff] }
  0xa1   :  { %v2465_v8 = vmin.f32 %v1291_v1, 6.0 }
  0xa2   :  { %526 = vperm.xlu2 %1852, %v180_v55  }
  0xa3   :  { %v2467_v9 = vpop.f32.mrf.mxu2  ;;  %691 = vperm.xlu1 %1851, %v213_v4   ;;  %686 = vperm.xlu0 %1850, %v212_v5   ;;  %v44_v4 = vld [vmem:[%s3149_s1 + $0xb0] sm:$0xff] }
  0xa4   :  { %3168 = vst [vmem:[#allocation10_spill] sm:$0xff] %v2467_v9  ;;  %v2471_v11 = vpop.f32.mrf.mxu0  ;;  %v2473_v13 = vpop.permute.xlu2 %361 }
  0xa5   :  { %3169 = vst [vmem:[#allocation11_spill] sm:$0xff] %v2473_v13  ;;  %v1105_v16 = vpop.f32.mrf.mxu1  ;;  %v2478_v17 = vpop.permute.xlu1 %311 }
  0xa6   :  { %v2486_v25 = vpop.permute.xlu0 %306  ;;  %v2488_v26 = vpop.f32.mrf.mxu3 }
  0xa7   :  { %3170 = vst [vmem:[#allocation12_spill] sm:$0xff] %v2488_v26  ;;  %1737 = vmatmul.msk.f32.gmra.mxu0 %vm694_vm0, %v42_v15 }
  0xa8   :  { %1768 = vmatmul.msk.f32.gmra.mxu1 %vm694_vm0, %v73_v21  ;;  %1792 = vmatmul.msk.f32.gmra.mxu2 %vm694_vm0, %v97_v22  ;;  %v75_v22 = vld [vmem:[%s3149_s1 + $0x1a8] sm:$0xff] }
  0xaa   :  { %601 = vperm.xlu2 %1852, %v195_v28   ;;  %v99_v28 = vld [vmem:[%s3149_s1 + $0x268] sm:$0xff] }
  0xab   :  { %v2502_v36 = vpop.f32.mrf.mxu2  ;;  %596 = vperm.xlu1 %1851, %v194_v29   ;;  %531 = vperm.xlu0 %1850, %v181_v30  }
  0xac   :  { %3171 = vst [vmem:[#allocation13_spill] sm:$0xff] %v2502_v36  ;;  %v2504_v38 = vpop.f32.mrf.mxu0  ;;  %v2506_v41 = vpop.permute.xlu2 %376  ;;  %v50_v36 = vld [vmem:[%s3149_s1 + $0xe0] sm:$0xff] }
  0xad   :  { %v2511_v47 = vpop.f32.mrf.mxu1  ;;  %v2513_v48 = vpop.permute.xlu1 %326 }
  0xae   :  { %3172 = vst [vmem:[#allocation14_spill] sm:$0xff] %v2513_v48  ;;  %v2521_v52 = vpop.permute.xlu0 %321  ;;  %v2523_v56 = vpop.f32.mrf.mxu3 }
  0xaf   :  { %3173 = vst [vmem:[#allocation15_spill] sm:$0xff] %v2521_v52  ;;  %1738 = vmatmul.msk.f32.gmra.mxu0 %vm694_vm0, %v43_v42  ;;  %v192_v42 = vld [vmem:[%s3147_s2 + $0x250] sm:$0xff] }
  0xb0   :  { %3174 = vst [vmem:[#allocation16_spill] sm:$0xff] %v2523_v56  ;;  %1769 = vmatmul.msk.f32.gmra.mxu1 %vm694_vm0, %v74_v49  ;;  %1793 = vmatmul.msk.f32.gmra.mxu2 %vm694_vm0, %v98_v50  ;;  %v179_v49 = vld [vmem:[%s3147_s2 + $0x1e8] sm:$0xff] }
  0xb2   :  { %516 = vperm.xlu2 %1852, %v178_v57  }
  0xb3   :  { %v2537_v61 = vpop.f32.mrf.mxu2  ;;  %681 = vperm.xlu1 %1851, %v211_v58   ;;  %676 = vperm.xlu0 %1850, %v210_v45  }
  0xb4   :  { %3175 = vst [vmem:[#allocation17_spill] sm:$0xff] %v2537_v61  ;;  %v1018_v1 = vpop.f32.mrf.mxu0  ;;  %v392_v55 = vpop.permute.xlu2 %391 }
  0xb5   :  { %v2542_v5 = vpop.f32.mrf.mxu1  ;;  %v2544_v15 = vadd.f32 %v1105_v16, %v392_v55  ;;  %v2546_v21 = vpop.permute.xlu1 %341  ;;  %v193_v16 = vld [vmem:[%s3147_s2 + $0x258] sm:$0xff]  ;;  %v1019_v50 = vadd.f32 %v1018_v1, %v2334_v6  ;;  %v76_v6 = vld [vmem:[%s3149_s1 + $0x1b0] sm:$0xff] }
  0xb6   :  { %3176 = vst [vmem:[#allocation18_spill] sm:$0xff] %v2546_v21  ;;  %v2554_v29 = vpop.permute.xlu0 %336  ;;  %v2556_v30 = vpop.f32.mrf.mxu3  ;;  %v45_v55 = vld [vmem:[%s3149_s1 + $0xb8] sm:$0xff] }
  0xb7   :  { %3177 = vst [vmem:[#allocation19_spill] sm:$0xff] %v2554_v29  ;;  %1739 = vmatmul.msk.f32.gmra.mxu0 %vm694_vm0, %v44_v4  ;;  %v1294_v4 = vmax.f32 %v1019_v50, 0.0  ;;  %v209_v50 = vld [vmem:[%s3147_s2 + $0x2d8] sm:$0xff]  ;;  %v46_v29 = vld [vmem:[%s3149_s1 + $0xc0] sm:$0xff] }
  0xb8   :  { %3178 = vst [vmem:[#allocation20_spill] sm:$0xff] %v2556_v30  ;;  %1770 = vmatmul.msk.f32.gmra.mxu1 %vm694_vm0, %v75_v22  ;;  %1794 = vmatmul.msk.f32.gmra.mxu2 %vm694_vm0, %v99_v28  ;;  %v204_v30 = vld [vmem:[%s3147_s2 + $0x2b0] sm:$0xff] }
  0xba   :  { %591 = vperm.xlu2 %1852, %v193_v16  }
  0xbb   :  { %v2571_v57 = vpop.f32.mrf.mxu2  ;;  %586 = vperm.xlu1 %1851, %v192_v42   ;;  %521 = vperm.xlu0 %1850, %v179_v49  }
  0xbc   :  { %3179 = vst [vmem:[#allocation21_spill] sm:$0xff] %v2571_v57  ;;  %v1021_v58 = vpop.f32.mrf.mxu0  ;;  %v407_v45 = vpop.permute.xlu2 %406 }
  0xbd   :  { %v1022_v22 = vadd.f32 %v1021_v58, %v2326_v3  ;;  %v1114_v28 = vpop.f32.mrf.mxu1  ;;  %v2577_v34 = vpop.permute.xlu1 %356  ;;  %v176_v3 = vld [vmem:[%s3147_s2 + $0x1d0] sm:$0xff] }
  0xbe   :  { %3180 = vst [vmem:[#allocation22_spill] sm:$0xff] %v2577_v34  ;;  %v2582_v1 = vadd.f32 %v1114_v28, %v407_v45  ;;  %v2584_v16 = vpop.permute.xlu0 %351  ;;  %v2586_v42 = vpop.f32.mrf.mxu3  ;;  %v208_v58 = vld [vmem:[%s3147_s2 + $0x2d0] sm:$0xff]  ;;  %v2599_v45 = vmin.f32 %v1294_v4, 6.0  ;;  %v47_v34 = vld [vmem:[%s3149_s1 + $0xc8] sm:$0xff] }
  0xbf   :  { %3181 = vst [vmem:[#allocation23_spill] sm:$0xff] %v2584_v16  ;;  %v1295_v49 = vmax.f32 %v1022_v22, 0.0  ;;  %1740 = vmatmul.msk.f32.gmra.mxu0 %vm694_vm0, %v45_v55  ;;  %v190_v22 = vld [vmem:[%s3147_s2 + $0x240] sm:$0xff] }
  0xc0   :  { %3182 = vst [vmem:[#allocation24_spill] sm:$0xff] %v2586_v42  ;;  %1771 = vmatmul.msk.f32.gmra.mxu1 %vm694_vm0, %v76_v6 }
  0xc1   :  { %v2601_v28 = vmin.f32 %v1295_v49, 6.0 }
  0xc2   :  { %506 = vperm.xlu2 %1852, %v176_v3  }
  0xc3   :  { %v2603_v55 = vpop.f32.mrf.mxu2  ;;  %671 = vperm.xlu1 %1851, %v209_v50   ;;  %666 = vperm.xlu0 %1850, %v208_v58   ;;  %v191_v58 = vld [vmem:[%s3147_s2 + $0x248] sm:$0xff] }
  0xc4   :  { %v1024_v6 = vpop.f32.mrf.mxu0  ;;  %v2607_v10 = vpop.permute.xlu2 %421 }
  0xc5   :  { %v2612_v21 = vpop.f32.mrf.mxu1  ;;  %v372_v4 = vpop.permute.xlu1 %371 }
  0xc6   :  { %v2615_v49 = vadd.f32 %v2324_v2, %v372_v4  ;;  %v2617_v3 = vpop.permute.xlu0 %366  ;;  %v2619_v50 = vpop.f32.mrf.mxu3  ;;  %v1025_v2 = vadd.f32 %v1024_v6, %v2234_v35  ;;  %v1097_v4 = vadd.f32 %v2359_v18, %v2506_v41  ;;  %v1323_v6 = vmax.f32 %v2544_v15, 0.0  ;;  %v207_v15 = vld [vmem:[%s3147_s2 + $0x2c8] sm:$0xff] }
  0xc7   :  { %3184 = vst [vmem:[#allocation26_spill] sm:$0xff] %v2617_v3  ;;  %1741 = vmatmul.msk.f32.gmra.mxu0 %vm694_vm0, %v46_v29 }
  0xc8   :  { %3183 = vst [vmem:[#allocation25_spill] sm:$0xff] %v2615_v49  ;;  %v1296_v49 = vmax.f32 %v1025_v2, 0.0 }
  0xc9   :  { %3185 = vst [vmem:[#allocation27_spill] sm:$0xff] %v2619_v50  ;;  %v49_v50 = vld [vmem:[%s3149_s1 + $0xd8] sm:$0xff] }
  0xca   :  { %581 = vperm.xlu2 %1852, %v191_v58  }
  0xcb   :  { %v2634_v16 = vpop.f32.mrf.mxu2  ;;  %576 = vperm.xlu1 %1851, %v190_v22   ;;  %511 = vperm.xlu0 %1850, %v177_v54   ;;  %v1320_v54 = vmax.f32 %v1097_v4, 0.0  ;;  %v2663_v4 = vmin.f32 %v1323_v6, 6.0 }
  0xcc   :  { %v1027_v29 = vpop.f32.mrf.mxu0  ;;  %v2636_v3 = vpop.permute.xlu2 %436 }
  0xcd   :  { %v1028_v13 = vadd.f32 %v1027_v29, %v2369_v23  ;;  %v2642_v63 = vpop.f32.mrf.mxu1  ;;  %v387_v35 = vpop.permute.xlu1 %386  ;;  %v188_v23 = vld [vmem:[%s3147_s2 + $0x230] sm:$0xff]  ;;  %v2659_v29 = vmin.f32 %v1296_v49, 6.0  ;;  %3187 = vst [vmem:[#allocation29_spill] sm:$0xff] %v2663_v4 }
  0xce   :  { %v1103_v18 = vadd.f32 %v2437_v59, %v387_v35  ;;  %v382_v41 = vpop.permute.xlu0 %381  ;;  %v2646_v22 = vpop.f32.mrf.mxu3  ;;  %v206_v59 = vld [vmem:[%s3147_s2 + $0x2c0] sm:$0xff]  ;;  %v2667_v35 = vmin.f32 %v1320_v54, 6.0 }
  0xcf   :  { %3186 = vst [vmem:[#allocation28_spill] sm:$0xff] %v2646_v22  ;;  %v1297_v58 = vmax.f32 %v1028_v13, 0.0  ;;  %v1100_v26 = vadd.f32 %v2402_v39, %v382_v41  ;;  %1742 = vmatmul.msk.f32.gmra.mxu0 %vm694_vm0, %v47_v34  ;;  %v187_v22 = vld [vmem:[%s3147_s2 + $0x228] sm:$0xff] }
  0xd0   :  { %v1322_v2 = vmax.f32 %v1103_v18, 0.0  ;;  %3189 = vst [vmem:[#allocation31_spill] sm:$0xff] %v2667_v35 }
  0xd1   :  { %v2661_v13 = vmin.f32 %v1297_v58, 6.0  ;;  %v1321_v39 = vmax.f32 %v1100_v26, 0.0  ;;  %v48_v26 = vld [vmem:[%s3149_s1 + $0xd0] sm:$0xff] }
  0xd2   :  { %v2665_v34 = vmin.f32 %v1322_v2, 6.0  ;;  %566 = vperm.xlu2 %1852, %v188_v23  }
  0xd3   :  { %v2669_v18 = vmin.f32 %v1321_v39, 6.0  ;;  %v2671_v41 = vpop.f32.mrf.mxu2  ;;  %661 = vperm.xlu1 %1851, %v207_v15   ;;  %656 = vperm.xlu0 %1850, %v206_v59  }
  0xd4   :  { %3188 = vst [vmem:[#allocation30_spill] sm:$0xff] %v2665_v34  ;;  %v2675_v56 = vpop.f32.mrf.mxu0  ;;  %v2677_v58 = vpop.permute.xlu2 %451 }
  0xd5   :  { %3190 = vst [vmem:[#allocation32_spill] sm:$0xff] %v2669_v18  ;;  %v2684_v54 = vpop.f32.mrf.mxu1  ;;  %v402_v23 = vpop.permute.xlu1 %401 }
  0xd6   :  { %3191 = vst [vmem:[#allocation33_spill] sm:$0xff] %v2671_v41  ;;  %v1112_v15 = vadd.f32 %v2542_v5, %v402_v23  ;;  %v397_v59 = vpop.permute.xlu0 %396  ;;  %v2689_v39 = vpop.f32.mrf.mxu3  ;;  %v205_v41 = vld [vmem:[%s3147_s2 + $0x2b8] sm:$0xff] }
  0xd7   :  { %3192 = vst [vmem:[#allocation34_spill] sm:$0xff] %v2689_v39  ;;  %v1109_v49 = vadd.f32 %v2511_v47, %v397_v59  ;;  %1743 = vmatmul.msk.f32.gmra.mxu0 %vm694_vm0, %v48_v26  ;;  %v189_v5 = vld [vmem:[%s3147_s2 + $0x238] sm:$0xff] }
  0xd8   :  { %v1325_v6 = vmax.f32 %v1112_v15, 0.0 }
  0xd9   :  { %v1324_v23 = vmax.f32 %v1109_v49, 0.0 }
  0xda   :  { %v2702_v2 = vmin.f32 %v1325_v6, 6.0  ;;  %651 = vperm.xlu2 %1852, %v205_v41   ;;  %v186_v41 = vld [vmem:[%s3147_s2 + $0x220] sm:$0xff] }
  0xdb   :  { %v2704_v47 = vmin.f32 %v1324_v23, 6.0  ;;  %v2706_v26 = vpop.f32.mrf.mxu2  ;;  %646 = vperm.xlu1 %1851, %v204_v30   ;;  %571 = vperm.xlu0 %1850, %v189_v5   ;;  %v1326_v30 = vmax.f32 %v2582_v1, 0.0 }
  0xdc   :  { %3193 = vst [vmem:[#allocation35_spill] sm:$0xff] %v2702_v2  ;;  %v2708_v59 = vpop.f32.mrf.mxu0  ;;  %v2710_v15 = vpop.permute.xlu2 %466 }
  0xdd   :  { %3194 = vst [vmem:[#allocation36_spill] sm:$0xff] %v2704_v47  ;;  %v2715_v42 = vpop.f32.mrf.mxu1  ;;  %v2717_v49 = vpop.permute.xlu1 %416 }
  0xde   :  { %3195 = vst [vmem:[#allocation37_spill] sm:$0xff] %v2706_v26  ;;  %v412_v6 = vpop.permute.xlu0 %411  ;;  %v2721_v23 = vpop.f32.mrf.mxu3  ;;  %v202_v26 = vld [vmem:[%s3147_s2 + $0x2a0] sm:$0xff] }
  0xdf   :  { %3196 = vst [vmem:[#allocation38_spill] sm:$0xff] %v2710_v15  ;;  %v1118_v5 = vadd.f32 %v2612_v21, %v412_v6  ;;  %1744 = vmatmul.msk.f32.gmra.mxu0 %vm694_vm0, %v49_v50 }
  0xe0   :  { %3197 = vst [vmem:[#allocation39_spill] sm:$0xff] %v2721_v23  ;;  %v2735_v23 = vmin.f32 %v1326_v30, 6.0 }
  0xe1   :  { %v1327_v39 = vmax.f32 %v1118_v5, 0.0  ;;  %v203_v5 = vld [vmem:[%s3147_s2 + $0x2a8] sm:$0xff] }
  0xe2   :  { %636 = vperm.xlu2 %1852, %v202_v26  }
  0xe3   :  { %v2737_v1 = vmin.f32 %v1327_v39, 6.0  ;;  %v2739_v21 = vpop.f32.mrf.mxu2  ;;  %561 = vperm.xlu1 %1851, %v187_v22   ;;  %556 = vperm.xlu0 %1850, %v186_v41   ;;  %v185_v22 = vld [vmem:[%s3147_s2 + $0x218] sm:$0xff]  ;;  %v184_v41 = vld [vmem:[%s3147_s2 + $0x210] sm:$0xff] }
  0xe4   :  { %3198 = vst [vmem:[#allocation40_spill] sm:$0xff] %v2739_v21  ;;  %v1036_v50 = vpop.f32.mrf.mxu0  ;;  %v2741_v6 = vpop.permute.xlu2 %481 }
  0xe5   :  { %3199 = vst [vmem:[#allocation41_spill] sm:$0xff] %v2741_v6  ;;  %v2746_v37 = vpop.f32.mrf.mxu1  ;;  %v2748_v51 = vpop.permute.xlu1 %431  ;;  %v1037_v14 = vadd.f32 %v1036_v50, %v2412_v44  ;;  %v1534_v44 = vld [vmem:[%s3150_s4] sm:$0xff] }
  0xe6   :  { %v2752_v39 = vpop.permute.xlu0 %426  ;;  %v2754_v30 = vpop.f32.mrf.mxu3 }
  0xe7   :  { %3200 = vst [vmem:[#allocation42_spill] sm:$0xff] %v2754_v30  ;;  %1745 = vmatmul.msk.f32.gmra.mxu0 %vm694_vm0, %v50_v36  ;;  %v51_v36 = vld [vmem:[%s3149_s1 + $0xe8] sm:$0xff]  ;;  %v1300_v50 = vmax.f32 %v1037_v14, 0.0 }
  0xea   :  { %551 = vperm.xlu2 %1852, %v185_v22   ;;  %v182_v22 = vld [vmem:[%s3147_s2 + $0x200] sm:$0xff] }
  0xeb   :  { %v2766_v26 = vpop.f32.mrf.mxu2  ;;  %546 = vperm.xlu1 %1851, %v184_v41   ;;  %641 = vperm.xlu0 %1850, %v203_v5   ;;  %v201_v41 = vld [vmem:[%s3147_s2 + $0x298] sm:$0xff]  ;;  %v200_v5 = vld [vmem:[%s3147_s2 + $0x290] sm:$0xff] }
  0xec   :  { %3201 = vst [vmem:[#allocation43_spill] sm:$0xff] %v2766_v26  ;;  %v1039_v21 = vpop.f32.mrf.mxu0  ;;  %v2768_v30 = vpop.permute.xlu2 %496 }
  0xed   :  { %3202 = vst [vmem:[#allocation44_spill] sm:$0xff] %v2768_v30  ;;  %v2773_v6 = vpop.f32.mrf.mxu1  ;;  %v447_v33 = vpop.permute.xlu1 %446  ;;  %v1040_v35 = vadd.f32 %v1039_v21, %v2404_v40  ;;  %v1034_v40 = vadd.f32 %v2708_v59, %v2261_v43 }
  0xee   :  { %v442_v9 = vpop.permute.xlu0 %441  ;;  %v2775_v48 = vpop.f32.mrf.mxu3  ;;  %v1133_v14 = vadd.f32 %v2773_v6, %v2636_v3 }
  0xef   :  { %3203 = vst [vmem:[#allocation45_spill] sm:$0xff] %v2775_v48  ;;  %1746 = vmatmul.msk.f32.gmra.mxu0 %vm694_vm0, %v51_v36  ;;  %v52_v36 = vld [vmem:[%s3149_s1 + $0xf0] sm:$0xff]  ;;  %v1301_v21 = vmax.f32 %v1040_v35, 0.0 }
  0xf0   :  { %v1332_v6 = vmax.f32 %v1133_v14, 0.0 }
  0xf2   :  { %536 = vperm.xlu2 %1852, %v182_v22   ;;  %v199_v22 = vld [vmem:[%s3147_s2 + $0x288] sm:$0xff] }
  0xf3   :  { %v2787_v26 = vpop.f32.mrf.mxu2  ;;  %631 = vperm.xlu1 %1851, %v201_v41   ;;  %626 = vperm.xlu0 %1850, %v200_v5   ;;  %v198_v41 = vld [vmem:[%s3147_s2 + $0x280] sm:$0xff]  ;;  %v183_v5 = vld [vmem:[%s3147_s2 + $0x208] sm:$0xff] }
  0xf4   :  { %3204 = vst [vmem:[#allocation46_spill] sm:$0xff] %v2787_v26  ;;  %v1042_v30 = vpop.f32.mrf.mxu0  ;;  %v2789_v48 = vpop.permute.xlu2 %611 }
  0xf5   :  { %v1135_v12 = vpop.f32.mrf.mxu1  ;;  %v2794_v57 = vpop.permute.xlu1 %461  ;;  %v1043_v26 = vadd.f32 %v1042_v30, %v2290_v53 }
  0xf6   :  { %v2796_v52 = vpop.permute.xlu0 %456  ;;  %v2798_v61 = vpop.f32.mrf.mxu3  ;;  %v1136_v35 = vadd.f32 %v1135_v12, %v442_v9 }
  0xf7   :  { %3205 = vst [vmem:[#allocation47_spill] sm:$0xff] %v2798_v61  ;;  %1747 = vmatmul.msk.f32.gmra.mxu0 %vm694_vm0, %v52_v36  ;;  %v1302_v34 = vmax.f32 %v1043_v26, 0.0 }
  0xf9   :  { %v1398_v26 = vmin.f32 %v1302_v34, 6.0 }
  0xfa   :  { %621 = vperm.xlu2 %1852, %v199_v22   ;;  %v1535_v22 = vld [vmem:[%s3150_s4 + $0x8] sm:$0xff] }
  0xfb   :  { %v2812_v61 = vpop.f32.mrf.mxu2  ;;  %616 = vperm.xlu1 %1851, %v198_v41   ;;  %541 = vperm.xlu0 %1850, %v183_v5  }
  0xfc   :  { %3206 = vst [vmem:[#allocation48_spill] sm:$0xff] %v2812_v61  ;;  %v1045_v36 = vpop.f32.mrf.mxu0  ;;  %v2814_v18 = vpop.permute.xlu2 %526  ;;  %v1397_v61 = vmin.f32 %v1301_v21, 6.0  ;;  %v1127_v21 = vadd.f32 %v2715_v42, %v2752_v39 }
  0xfd   :  { %v1046_v4 = vadd.f32 %v1045_v36, %v2447_v62  ;;  %v1138_v47 = vpop.f32.mrf.mxu1  ;;  %v2818_v2 = vpop.permute.xlu1 %476  ;;  %v1031_v62 = vadd.f32 %v2675_v56, %v2361_v20  ;;  %v1299_v36 = vmax.f32 %v1034_v40, 0.0  ;;  %v1130_v40 = vadd.f32 %v2746_v37, %v2748_v51 }
  0xfe   :  { %3207 = vst [vmem:[#allocation49_spill] sm:$0xff] %v2818_v2  ;;  %v2820_v15 = vpop.permute.xlu0 %471  ;;  %v2822_v53 = vpop.f32.mrf.mxu3  ;;  %v1139_v5 = vadd.f32 %v1138_v47, %v447_v33  ;;  %v1121_v37 = vadd.f32 %v2642_v63, %v2717_v49  ;;  %v1330_v39 = vmax.f32 %v1127_v21, 0.0  ;;  %v1124_v63 = vadd.f32 %v2684_v54, %v2607_v10 }
  0xff   :  { %3208 = vst [vmem:[#allocation50_spill] sm:$0xff] %v2820_v15  ;;  %v1303_v30 = vmax.f32 %v1046_v4, 0.0  ;;  %v1396_v15 = vmin.f32 %v1300_v50, 6.0  ;;  %v1395_v12 = vmin.f32 %v1299_v36, 6.0  ;;  %v1428_v49 = vmin.f32 %v1332_v6, 6.0 }
 0x100   :  { %3209 = vst [vmem:[#allocation51_spill] sm:$0xff] %v2822_v53  ;;  %v1298_v53 = vmax.f32 %v1031_v62, 0.0  ;;  %v1334_v33 = vmax.f32 %v1139_v5, 0.0  ;;  %v3210_v10 = vpack.c.bf16 %v2661_v13, %v2659_v29 }
 0x101   :  { %v1399_v41 = vmin.f32 %v1303_v30, 6.0  ;;  %v1492_v9 = vpack.c.bf16 %v1397_v61, %v1396_v15  ;;  %v1333_v30 = vmax.f32 %v1136_v35, 0.0  ;;  %v1016_v61 = vadd.f32 %v2504_v38, %v2207_v27 }
 0x102   :  { %v1331_v15 = vmax.f32 %v1130_v40, 0.0 }
 0x103   :  { %v2834_v43 = vpop.f32.mrf.mxu2  ;;  %1543 = vperm.xlu1 %1851, %v1535_v22   ;;  %1538 = vperm.xlu0 %1850, %v1534_v44   ;;  %v1493_v4 = vpack.c.bf16 %v1399_v41, %v1398_v26  ;;  %v1394_v44 = vmin.f32 %v1298_v53, 6.0  ;;  %v1429_v53 = vmin.f32 %v1333_v30, 6.0  ;;  %v1293_v35 = vmax.f32 %v1016_v61, 0.0 }
 0x104   :  { %v1048_v59 = vpop.f32.mrf.mxu0  ;;  %v2836_v2 = vpop.permute.xlu2 %601 }
 0x105   :  { %v1141_v31 = vpop.f32.mrf.mxu1  ;;  %1576 = vmatpush.bf16.msrb.mxu1 %v1493_v4  ;;  %v2838_v20 = vpop.permute.xlu1 %491  ;;  %v1049_v3 = vadd.f32 %v1048_v59, %v2439_v60  ;;  %v1491_v42 = vpack.c.bf16 %v1395_v12, %v1394_v44  ;;  %v1328_v59 = vmax.f32 %v1121_v37, 0.0 }
 0x106   :  { %v1142_v56 = vadd.f32 %v1141_v31, %v2677_v58  ;;  %v2843_v34 = vpop.permute.xlu0 %486  ;;  %v2845_v47 = vpop.f32.mrf.mxu3  ;;  %v1238_v31 = vadd.f32 %v2414_v46, %v2789_v48  ;;  %v1430_v58 = vmin.f32 %v1334_v33, 6.0  ;;  %v1013_v46 = vadd.f32 %v2471_v11, %v2180_v19 }
 0x107   :  { %v1304_v48 = vmax.f32 %v1049_v3, 0.0  ;;  %v1427_v19 = vmin.f32 %v1331_v15, 6.0  ;;  %v1426_v11 = vmin.f32 %v1330_v39, 6.0  ;;  %v1424_v6 = vmin.f32 %v1328_v59, 6.0 }
 0x108   :  { %v1335_v22 = vmax.f32 %v1142_v56, 0.0  ;;  %v1367_v5 = vmax.f32 %v1238_v31, 0.0  ;;  %v1292_v12 = vmax.f32 %v1013_v46, 0.0  ;;  %v3212_v59 = vpack.c.bf16 %v2465_v8, %v2463_v7 }
 0x109   :  { %1577 = vmatpush.bf16.msrb.mxu1 %v1492_v9  ;;  %v2870_v9 = vmin.f32 %v1304_v48, 6.0 }
 0x10a   :  { %v1431_v62 = vmin.f32 %v1335_v22, 6.0  ;;  %v2877_v54 = vmin.f32 %v1367_v5, 6.0  ;;  %v1389_v22 = vmin.f32 %v1293_v35, 6.0 }
 0x10b   :  { %v2858_v51 = vpop.f32.mrf.mxu2 }
 0x10c   :  { %v1051_v60 = vpop.f32.mrf.mxu0  ;;  %v2860_v50 = vpop.permute.xlu2 %516  ;;  %v1509_v26 = vpack.c.bf16 %v1431_v62, %v1430_v58  ;;  %v1507_v58 = vpack.c.bf16 %v1427_v19, %v1426_v11  ;;  %v1388_v62 = vmin.f32 %v1292_v12, 6.0  ;;  %v1840_v19 = vld [vmem:[%s3151_s3 + $0x14] sm:$0xf0] }
 0x10d   :  { %v1052_v41 = vadd.f32 %v1051_v60, %v2319_v0  ;;  %v1144_v27 = vpop.f32.mrf.mxu1  ;;  %1578 = vmatpush.bf16.msrb.mxu1 %v1491_v42  ;;  %v607_v38 = vpop.permute.xlu1 %606  ;;  %v1508_v0 = vpack.c.bf16 %v1429_v53, %v1428_v49 }
 0x10e   :  { %v1235_v36 = vadd.f32 %v2371_v24, %v607_v38  ;;  %v2868_v4 = vpop.permute.xlu0 %501  ;;  %1604 = vmatpush.bf16.msrb.mxu3 %v1509_v26  ;;  %v1282_v56 = vpop.f32.mrf.mxu3  ;;  %v1329_v24 = vmax.f32 %v1124_v63, 0.0  ;;  %v1145_v21 = vadd.f32 %v1144_v27, %v2796_v52  ;;  %v3211_v52 = vpack.c.bf16 %v2601_v28, %v2599_v45 }
 0x10f   :  { %v1305_v14 = vmax.f32 %v1052_v41, 0.0  ;;  %v1488_v60 = vpack.c.bf16 %v1389_v22, %v1388_v62  ;;  %v1187_v28 = vadd.f32 %v2603_v55, %v2814_v18  ;;  %v1815_v18 = vld [vmem:[%s3151_s3] sm:$0xf] }
 0x110   :  { %v1366_v33 = vmax.f32 %v1235_v36, 0.0  ;;  %v1425_v42 = vmin.f32 %v1329_v24, 6.0  ;;  %v1336_v15 = vmax.f32 %v1145_v21, 0.0  ;;  %v3214_v21 = vld [vmem:[#allocation4_spill] sm:$0xff] }
 0x111   :  { %v2872_v40 = vmin.f32 %v1305_v14, 6.0  ;;  %1579 = vmatpush.bf16.msrb.mxu1 %v3210_v10  ;;  %v3215_v22 = vpack.c.bf16 %v2390_v32, %v3214_v21  ;;  %v3229_v21 = vld [vmem:[#allocation17_spill] sm:$0xff] }
 0x112   :  { %v2880_v30 = vmin.f32 %v1366_v33, 6.0  ;;  %1605 = vmatpush.bf16.msrb.mxu3 %v1508_v0  ;;  %v1506_v48 = vpack.c.bf16 %v1425_v42, %v1424_v6  ;;  %v2895_v41 = vmin.f32 %v1336_v15, 6.0  ;;  %v1350_v33 = vmax.f32 %v1187_v28, 0.0 }
 0x113   :  { %v2882_v44 = vpop.f32.mrf.mxu2  ;;  %v1494_v3 = vpack.c.bf16 %v2872_v40, %v2870_v9  ;;  %v3266_v9 = vld [vmem:[#allocation37_spill] sm:$0xff] }
 0x114   :  { %v1525_v31 = vpack.c.bf16 %v2877_v54, %v2880_v30  ;;  %v1054_v29 = vpop.f32.mrf.mxu0  ;;  %v2888_v13 = vpop.permute.xlu2 %591 }
 0x115   :  { %v1147_v61 = vpop.f32.mrf.mxu1  ;;  %1580 = vmatpush.bf16.msrb.mxu1 %v3211_v52  ;;  %v692_v37 = vpop.permute.xlu1 %691  ;;  %v1055_v26 = vadd.f32 %v1054_v29, %v2486_v25  ;;  %v3216_v29 = vld [vmem:[#allocation38_spill] sm:$0xff] }
 0x116   :  { %v1148_v39 = vadd.f32 %v1147_v61, %v2794_v57  ;;  %v687_v53 = vpop.permute.xlu0 %686  ;;  %1606 = vmatpush.bf16.msrb.mxu3 %v1507_v58  ;;  %v1285_v45 = vpop.f32.mrf.mxu3  ;;  %v1446_v61 = vmin.f32 %v1350_v33, 6.0 }
 0x117   :  { %v1306_v57 = vmax.f32 %v1055_v26, 0.0  ;;  %v1283_v5 = vadd.f32 %v1282_v56, %v687_v53  ;;  %v1286_v55 = vadd.f32 %v1285_v45, %v692_v37  ;;  %v1816_v56 = vor.u32 %v1840_v19, %v1815_v18 }
 0x118   :  { %v1337_v46 = vmax.f32 %v1148_v39, 0.0 }
 0x119   :  { %1581 = vmatpush.bf16.msrb.mxu1 %v1488_v60  ;;  %v2923_v8 = vmin.f32 %v1306_v57, 6.0  ;;  %v1382_v12 = vmax.f32 %v1283_v5, 0.0  ;;  %v1383_v6 = vmax.f32 %v1286_v55, 0.0  ;;  %v3222_v5 = vld [vmem:[#allocation30_spill] sm:$0xff] }
 0x11a   :  { %v2897_v27 = vmin.f32 %v1337_v46, 6.0  ;;  %1607 = vmatpush.bf16.msrb.mxu3 %v1506_v48  ;;  %v3220_v48 = vld [vmem:[#allocation50_spill] sm:$0xff] }
 0x11b   :  { %v2901_v38 = vpop.f32.mrf.mxu2  ;;  %v1478_v39 = vmin.f32 %v1382_v12, 6.0  ;;  %v1479_v53 = vmin.f32 %v1383_v6, 6.0  ;;  %v3227_v12 = vld [vmem:[#allocation31_spill] sm:$0xff] }
 0x11c   :  { %v1510_v63 = vpack.c.bf16 %v2897_v27, %v2895_v41  ;;  %v1057_v49 = vpop.f32.mrf.mxu0  ;;  %v2905_v25 = vpop.permute.xlu2 %506 }
 0x11d   :  { %v1058_v36 = vadd.f32 %v1057_v49, %v2478_v17  ;;  %v1150_v35 = vpop.f32.mrf.mxu1  ;;  %1582 = vmatpush.bf16.msrb.mxu1 %v3212_v59  ;;  %v2911_v14 = vpop.permute.xlu1 %596  ;;  %v3213_v17 = vpack.c.bf16 %v2737_v1, %v2735_v23  ;;  %v3217_v23 = vld [vmem:[#allocation35_spill] sm:$0xff]  ;;  %v3218_v1 = vld [vmem:[#allocation36_spill] sm:$0xff]  ;;  %v3221_v49 = vld [vmem:[#allocation29_spill] sm:$0xff]  ;;  %v1533_v19 = vpack.c.bf16 %v1479_v53, %v1478_v39 }
 0x11e   :  { %v532_v11 = vpop.permute.xlu0 %531  ;;  %v1151_v58 = vadd.f32 %v1150_v35, %v3216_v29  ;;  %v3219_v62 = vpack.c.bf16 %v3217_v23, %v3218_v1  ;;  %v3224_v35 = vld [vmem:[#allocation51_spill] sm:$0xff] }
 0x11f   :  { %1608 = vmatpush.bf16.msrb.mxu3 %v3213_v17  ;;  %v1307_v0 = vmax.f32 %v1058_v36, 0.0  ;;  %v1190_v7 = vadd.f32 %v2634_v16, %v532_v11  ;;  %v3223_v36 = vpack.c.bf16 %v3221_v49, %v3222_v5  ;;  %v3225_v11 = vld [vmem:[#allocation3_spill] sm:$0xff] }
 0x120   :  { %v1338_v46 = vmax.f32 %v1151_v58, 0.0 }
 0x121   :  { %v2925_v10 = vmin.f32 %v1307_v0, 6.0  ;;  %v1351_v24 = vmax.f32 %v1190_v7, 0.0  ;;  %1583 = vmatpush.bf16.msrb.mxu1 %v3215_v22  ;;  %v1181_v22 = vadd.f32 %v3229_v21, %v2860_v50  ;;  %v3233_v21 = vld [vmem:[#allocation2_spill] sm:$0xff] }
 0x122   :  { %v2945_v0 = vmin.f32 %v1338_v46, 6.0 }
 0x123   :  { %1609 = vmatpush.bf16.msrb.mxu3 %v3219_v62  ;;  %v1447_v16 = vmin.f32 %v1351_v24, 6.0  ;;  %v1222_v52 = vpop.f32.mrf.mxu2  ;;  %v1495_v37 = vpack.c.bf16 %v2925_v10, %v2923_v8 }
 0x124   :  { %v1060_v42 = vpop.f32.mrf.mxu0  ;;  %1584 = vmatmul.bf16.vlgmr.msrb.gmra.mxu1 %v1816_v56  ;;  %v2936_v15 = vpop.permute.xlu2 %581 }
 0x125   :  { %v1517_v32 = vpack.c.bf16 %v1447_v16, %v1446_v61  ;;  %v1153_v60 = vpop.f32.mrf.mxu1  ;;  %v682_v26 = vpop.permute.xlu1 %681  ;;  %v1061_v17 = vadd.f32 %v1060_v42, %v3225_v11  ;;  %v3230_v42 = vld [vmem:[#allocation15_spill] sm:$0xff] }
 0x126   :  { %v1154_v45 = vadd.f32 %v1153_v60, %v3220_v48  ;;  %v1280_v28 = vadd.f32 %v2845_v47, %v682_v26  ;;  %v677_v57 = vpop.permute.xlu0 %676  ;;  %v3226_v47 = vld [vmem:[#allocation32_spill] sm:$0xff]  ;;  %v1348_v48 = vmax.f32 %v1181_v22, 0.0  ;;  %v1166_v22 = vadd.f32 %v3233_v21, %v2838_v20 }
 0x127   :  { %1610 = vmatpush.bf16.msrb.mxu3 %v3223_v36  ;;  %v1277_v59 = vadd.f32 %v3224_v35, %v677_v57  ;;  %1618 = vmatpush.bf16.msra.mxu1 %v1517_v32  ;;  %v3228_v24 = vpack.c.bf16 %v3226_v47, %v3227_v12  ;;  %v1308_v61 = vmax.f32 %v1061_v17, 0.0  ;;  %v3232_v47 = vld [vmem:[#allocation47_spill] sm:$0xff]  ;;  %v3237_v20 = vld [vmem:[#allocation44_spill] sm:$0xff] }
 0x128   :  { %v1339_v55 = vmax.f32 %v1154_v45, 0.0  ;;  %v1381_v18 = vmax.f32 %v1280_v28, 0.0  ;;  %v3231_v28 = vld [vmem:[#allocation21_spill] sm:$0xff] }
 0x129   :  { %v1380_v33 = vmax.f32 %v1277_v59, 0.0  ;;  %v2964_v49 = vmin.f32 %v1308_v61, 6.0 }
 0x12a   :  { %v2947_v7 = vmin.f32 %v1339_v55, 6.0  ;;  %v1477_v56 = vmin.f32 %v1381_v18, 6.0 }
 0x12b   :  { %1611 = vmatpush.bf16.msrb.mxu3 %v3228_v24  ;;  %v1476_v6 = vmin.f32 %v1380_v33, 6.0  ;;  %v1225_v29 = vpop.f32.mrf.mxu2 }
 0x12c   :  { %v1511_v58 = vpack.c.bf16 %v2947_v7, %v2945_v0  ;;  %v1226_v23 = vadd.f32 %v1225_v29, %v2888_v13  ;;  %v1063_v1 = vpop.f32.mrf.mxu0  ;;  %v567_v62 = vpop.permute.xlu2 %566 }
 0x12d   :  { %v1532_v16 = vpack.c.bf16 %v1477_v56, %v1476_v6  ;;  %v1064_v39 = vadd.f32 %v1063_v1, %v3230_v42  ;;  %v2958_v32 = vpop.f32.mrf.mxu1  ;;  %v2961_v53 = vadd.f32 %v2834_v43, %v567_v62  ;;  %v587_v50 = vpop.permute.xlu1 %586  ;;  %v1444_v43 = vmin.f32 %v1348_v48, 6.0  ;;  %v3234_v6 = vld [vmem:[#allocation45_spill] sm:$0xff]  ;;  %v3235_v62 = vld [vmem:[#allocation14_spill] sm:$0xff] }
 0x12e   :  { %v1363_v60 = vmax.f32 %v1226_v23, 0.0  ;;  %v1223_v26 = vadd.f32 %v1222_v52, %v587_v50  ;;  %v522_v46 = vpop.permute.xlu0 %521  ;;  %v1220_v42 = vadd.f32 %v2901_v38, %v2936_v15  ;;  %v1343_v50 = vmax.f32 %v1166_v22, 0.0  ;;  %v3240_v38 = vld [vmem:[#allocation6_spill] sm:$0xff] }
 0x12f   :  { %1646 = vmatpush.bf16.msra.mxu3 %v1533_v19  ;;  %v1309_v45 = vmax.f32 %v1064_v39, 0.0  ;;  %v1184_v57 = vadd.f32 %v3231_v28, %v522_v46 }
 0x130   :  { %v1362_v13 = vmax.f32 %v1223_v26, 0.0  ;;  %v2968_v35 = vmin.f32 %v1363_v60, 6.0  ;;  %v3236_v60 = vld [vmem:[#allocation10_spill] sm:$0xff]  ;;  %v1439_v21 = vmin.f32 %v1343_v50, 6.0 }
 0x131   :  { %v2966_v5 = vmin.f32 %v1309_v45, 6.0  ;;  %v1349_v36 = vmax.f32 %v1184_v57, 0.0  ;;  %v1175_v26 = vadd.f32 %v3236_v60, %v2905_v25  ;;  %v3238_v45 = vld [vmem:[#allocation5_spill] sm:$0xff] }
 0x132   :  { %v2970_v59 = vmin.f32 %v1362_v13, 6.0  ;;  %v1169_v28 = vadd.f32 %v3238_v45, %v3237_v20 }
 0x133   :  { %1647 = vmatpush.bf16.msra.mxu3 %v1532_v16  ;;  %v1445_v55 = vmin.f32 %v1349_v36, 6.0  ;;  %v1228_v18 = vpop.f32.mrf.mxu2  ;;  %v1496_v52 = vpack.c.bf16 %v2966_v5, %v2964_v49  ;;  %v3239_v36 = vld [vmem:[#allocation7_spill] sm:$0xff]  ;;  %v1346_v22 = vmax.f32 %v1175_v26, 0.0  ;;  %v1817_v49 = vld [vmem:[%s3151_s3 + $0x18] sm:$0xf0] }
 0x134   :  { %v1523_v19 = vpack.c.bf16 %v2968_v35, %v2970_v59  ;;  %v1066_v11 = vpop.f32.mrf.mxu0  ;;  %v1229_v23 = vadd.f32 %v1228_v18, %v2911_v14  ;;  %v1831_v35 = vld [vmem:[%s3151_s3 + $0x10] sm:$0xf]  ;;  %v1842_v59 = vld [vmem:[%s3151_s3 + $0x24] sm:$0xf0] }
 0x135   :  { %v1516_v17 = vpack.c.bf16 %v1445_v55, %v1444_v43  ;;  %v1159_v33 = vpop.f32.mrf.mxu1  ;;  %v672_v56 = vpop.permute.xlu1 %671  ;;  %v1067_v61 = vadd.f32 %v1066_v11, %v3235_v62  ;;  %v1172_v43 = vadd.f32 %v3239_v36, %v2868_v4 }
 0x136   :  { %v1274_v12 = vadd.f32 %v3232_v47, %v672_v56  ;;  %v667_v24 = vpop.permute.xlu0 %666  ;;  %v1364_v57 = vmax.f32 %v1229_v23, 0.0  ;;  %v1361_v56 = vmax.f32 %v1220_v42, 0.0 }
 0x137   :  { %v1271_v29 = vadd.f32 %v3234_v6, %v667_v24  ;;  %1619 = vmatpush.bf16.msra.mxu1 %v1516_v17  ;;  %v1310_v55 = vmax.f32 %v1067_v61, 0.0 }
 0x138   :  { %v1379_v1 = vmax.f32 %v1274_v12, 0.0  ;;  %v2995_v4 = vmin.f32 %v1364_v57, 6.0 }
 0x139   :  { %v1378_v16 = vmax.f32 %v1271_v29, 0.0  ;;  %v3241_v29 = vld [vmem:[#allocation13_spill] sm:$0xff]  ;;  %v2999_v42 = vmin.f32 %v1310_v55, 6.0 }
 0x13a   :  { %v1475_v39 = vmin.f32 %v1379_v1, 6.0 }
 0x13b   :  { %v1474_v46 = vmin.f32 %v1378_v16, 6.0  ;;  %v1231_v48 = vpop.f32.mrf.mxu2  ;;  %v1345_v16 = vmax.f32 %v1172_v43, 0.0  ;;  %v3242_v43 = vld [vmem:[#allocation41_spill] sm:$0xff] }
 0x13c   :  { %v1232_v14 = vadd.f32 %v1231_v48, %v2836_v2  ;;  %v1069_v13 = vpop.f32.mrf.mxu0  ;;  %v652_v2 = vpop.permute.xlu2 %651  ;;  %v1442_v48 = vmin.f32 %v1346_v22, 6.0  ;;  %v1160_v55 = vadd.f32 %v1159_v33, %v3242_v43 }
 0x13d   :  { %v1531_v18 = vpack.c.bf16 %v1475_v39, %v1474_v46  ;;  %v1070_v15 = vadd.f32 %v1069_v13, %v3240_v38  ;;  %v1162_v11 = vpop.f32.mrf.mxu1  ;;  %v577_v17 = vpop.permute.xlu1 %576  ;;  %v3003_v39 = vmin.f32 %v1361_v56, 6.0  ;;  %v1344_v46 = vmax.f32 %v1169_v28, 0.0  ;;  %v3244_v56 = vld [vmem:[#allocation49_spill] sm:$0xff] }
 0x13e   :  { %v1365_v25 = vmax.f32 %v1232_v14, 0.0  ;;  %v1163_v47 = vadd.f32 %v1162_v11, %v2843_v34  ;;  %v1217_v12 = vadd.f32 %v2882_v44, %v577_v17  ;;  %v512_v24 = vpop.permute.xlu0 %511  ;;  %v1441_v36 = vmin.f32 %v1345_v16, 6.0 }
 0x13f   :  { %v1311_v6 = vmax.f32 %v1070_v15, 0.0  ;;  %v1178_v23 = vadd.f32 %v3241_v29, %v512_v24  ;;  %1648 = vmatpush.bf16.msra.mxu3 %v1531_v18  ;;  %v3243_v15 = vld [vmem:[#allocation42_spill] sm:$0xff]  ;;  %v1440_v28 = vmin.f32 %v1344_v46, 6.0  ;;  %v1341_v22 = vmax.f32 %v1160_v55, 0.0 }
 0x140   :  { %v2997_v1 = vmin.f32 %v1365_v25, 6.0  ;;  %v1342_v62 = vmax.f32 %v1163_v47, 0.0  ;;  %v1360_v61 = vmax.f32 %v1217_v12, 0.0  ;;  %v1157_v25 = vadd.f32 %v2958_v32, %v3244_v56  ;;  %v3245_v47 = vld [vmem:[#allocation39_spill] sm:$0xff] }
 0x141   :  { %v3001_v34 = vmin.f32 %v1311_v6, 6.0  ;;  %v1347_v44 = vmax.f32 %v1178_v23, 0.0  ;;  %v3246_v23 = vld [vmem:[#allocation34_spill] sm:$0xff] }
 0x142   :  { %v1524_v50 = vpack.c.bf16 %v2997_v1, %v2995_v4  ;;  %v1438_v60 = vmin.f32 %v1342_v62, 6.0  ;;  %v3007_v26 = vmin.f32 %v1360_v61, 6.0  ;;  %v1262_v62 = vadd.f32 %v3246_v23, %v652_v2 }
 0x143   :  { %v1443_v20 = vmin.f32 %v1347_v44, 6.0  ;;  %v1497_v45 = vpack.c.bf16 %v3001_v34, %v2999_v42  ;;  %v1340_v61 = vmax.f32 %v1157_v25, 0.0  ;;  %v1837_v42 = vld [vmem:[%s3151_s3 + $0x4] sm:$0xf] }
 0x144   :  { %v1513_v57 = vpack.c.bf16 %v1439_v21, %v1438_v60  ;;  %v1522_v14 = vpack.c.bf16 %v3003_v39, %v3007_v26  ;;  %v3013_v13 = vpop.f32.mrf.mxu0  ;;  %v1514_v21 = vpack.c.bf16 %v1441_v36, %v1440_v28  ;;  %v637_v6 = vpop.permute.xlu2 %636  ;;  %v1437_v60 = vmin.f32 %v1341_v22, 6.0 }
 0x145   :  { %v1515_v18 = vpack.c.bf16 %v1443_v20, %v1442_v48  ;;  %v662_v38 = vpop.permute.xlu1 %661  ;;  %v1375_v32 = vmax.f32 %v1262_v62, 0.0  ;;  %v3247_v20 = vld [vmem:[#allocation28_spill] sm:$0xff]  ;;  %v1358_v36 = vmax.f32 %v2961_v53, 0.0  ;;  %v1820_v5 = vor.u32 %v1837_v42, %v1817_v49 }
 0x146   :  { %v1268_v11 = vadd.f32 %v3243_v15, %v662_v38  ;;  %v657_v17 = vpop.permute.xlu0 %656  ;;  %v1436_v38 = vmin.f32 %v1340_v61, 6.0  ;;  %v3250_v61 = vld [vmem:[#allocation43_spill] sm:$0xff] }
 0x147   :  { %v1265_v12 = vadd.f32 %v3245_v47, %v657_v17  ;;  %1620 = vmatpush.bf16.msra.mxu1 %v1515_v18  ;;  %v1471_v17 = vmin.f32 %v1375_v32, 6.0  ;;  %v3026_v56 = vmin.f32 %v1358_v36, 6.0 }
 0x148   :  { %v1377_v24 = vmax.f32 %v1268_v11, 0.0  ;;  %v1512_v15 = vpack.c.bf16 %v1437_v60, %v1436_v38 }
 0x149   :  { %v1376_v29 = vmax.f32 %v1265_v12, 0.0 }
 0x14a   :  { %v1473_v33 = vmin.f32 %v1377_v24, 6.0 }
 0x14b   :  { %v1472_v16 = vmin.f32 %v1376_v29, 6.0  ;;  %1621 = vmatpush.bf16.msra.mxu1 %v1514_v21  ;;  %v3249_v29 = vld [vmem:[#allocation46_spill] sm:$0xff] }
 0x14c   :  { %v3021_v44 = vpop.f32.mrf.mxu0  ;;  %v552_v25 = vpop.permute.xlu2 %551 }
 0x14d   :  { %v1530_v46 = vpack.c.bf16 %v1473_v33, %v1472_v16  ;;  %v647_v48 = vpop.permute.xlu1 %646  ;;  %v1202_v16 = vadd.f32 %v3250_v61, %v552_v25 }
 0x14e   :  { %v1259_v43 = vadd.f32 %v3247_v20, %v647_v48  ;;  %v572_v18 = vpop.permute.xlu0 %571 }
 0x14f   :  { %v1214_v55 = vadd.f32 %v2858_v51, %v572_v18  ;;  %1622 = vmatpush.bf16.msra.mxu1 %v1513_v57  ;;  %1649 = vmatpush.bf16.msra.mxu3 %v1530_v46  ;;  %v3248_v57 = vld [vmem:[#allocation48_spill] sm:$0xff] }
 0x150   :  { %v1374_v2 = vmax.f32 %v1259_v43, 0.0  ;;  %v3251_v46 = vld [vmem:[#allocation24_spill] sm:$0xff] }
 0x151   :  { %v1359_v11 = vmax.f32 %v1214_v55, 0.0  ;;  %v1253_v48 = vadd.f32 %v3251_v46, %v637_v6  ;;  %v3252_v18 = vld [vmem:[#allocation40_spill] sm:$0xff] }
 0x152   :  { %v1470_v28 = vmin.f32 %v1374_v2, 6.0  ;;  %v3253_v2 = vld [vmem:[#allocation27_spill] sm:$0xff] }
 0x153   :  { %v3028_v47 = vmin.f32 %v1359_v11, 6.0  ;;  %1623 = vmatpush.bf16.msra.mxu1 %v1512_v15  ;;  %v1372_v55 = vmax.f32 %v1253_v48, 0.0 }
 0x154   :  { %v1529_v12 = vpack.c.bf16 %v1471_v17, %v1470_v28  ;;  %v3030_v24 = vpop.f32.mrf.mxu0  ;;  %v3048_v43 = vpop.permute.xlu2 %536 }
 0x155   :  { %v1521_v53 = vpack.c.bf16 %v3028_v47, %v3026_v56  ;;  %v562_v51 = vpop.permute.xlu1 %561  ;;  %v1468_v27 = vmin.f32 %v1372_v55, 6.0  ;;  %v3257_v55 = vld [vmem:[#allocation9_spill] sm:$0xff] }
 0x156   :  { %v1208_v21 = vadd.f32 %v3248_v57, %v562_v51  ;;  %v557_v22 = vpop.permute.xlu0 %556  ;;  %1650 = vmatpush.bf16.msra.mxu3 %v1529_v12  ;;  %v3254_v57 = vld [vmem:[#allocation20_spill] sm:$0xff] }
 0x157   :  { %v1205_v23 = vadd.f32 %v3249_v29, %v557_v22  ;;  %1624 = vmatpush.bf16.msra.mxu1 %v1511_v58  ;;  %v1355_v58 = vmax.f32 %v1202_v16, 0.0  ;;  %v3256_v16 = vld [vmem:[#allocation12_spill] sm:$0xff] }
 0x158   :  { %v1357_v62 = vmax.f32 %v1208_v21, 0.0 }
 0x159   :  { %v1356_v33 = vmax.f32 %v1205_v23, 0.0  ;;  %v3054_v17 = vmin.f32 %v1355_v58, 6.0  ;;  %v3255_v23 = vld [vmem:[#allocation16_spill] sm:$0xff] }
 0x15a   :  { %v3040_v60 = vmin.f32 %v1357_v62, 6.0 }
 0x15b   :  { %v3043_v32 = vmin.f32 %v1356_v33, 6.0  ;;  %1625 = vmatpush.bf16.msra.mxu1 %v1510_v63 }
 0x15c   :  { %v1081_v20 = vpop.f32.mrf.mxu0  ;;  %v622_v29 = vpop.permute.xlu2 %621 }
 0x15d   :  { %v1520_v0 = vpack.c.bf16 %v3040_v60, %v3043_v32  ;;  %v547_v7 = vpop.permute.xlu1 %546  ;;  %v1244_v46 = vadd.f32 %v3256_v16, %v622_v29 }
 0x15e   :  { %v1199_v38 = vadd.f32 %v3252_v18, %v547_v7  ;;  %v642_v36 = vpop.permute.xlu0 %641 }
 0x15f   :  { %v1256_v6 = vadd.f32 %v3253_v2, %v642_v36  ;;  %v1369_v36 = vmax.f32 %v1244_v46, 0.0 }
 0x160   :  { %v1354_v15 = vmax.f32 %v1199_v38, 0.0 }
 0x161   :  { %v1373_v11 = vmax.f32 %v1256_v6, 0.0 }
 0x162   :  { %v3056_v41 = vmin.f32 %v1354_v15, 6.0  ;;  %v1465_v15 = vmin.f32 %v1369_v36, 6.0 }
 0x163   :  { %v1469_v63 = vmin.f32 %v1373_v11, 6.0 }
 0x164   :  { %v1519_v28 = vpack.c.bf16 %v3054_v17, %v3056_v41  ;;  %v1084_v25 = vpop.f32.mrf.mxu0 }
 0x165   :  { %v1528_v12 = vpack.c.bf16 %v1469_v63, %v1468_v27  ;;  %v632_v51 = vpop.permute.xlu1 %631  ;;  %v3258_v27 = vld [vmem:[#allocation11_spill] sm:$0xff] }
 0x166   :  { %v1250_v21 = vadd.f32 %v3254_v57, %v632_v51  ;;  %v627_v22 = vpop.permute.xlu0 %626  ;;  %v3259_v57 = vld [vmem:[#allocation25_spill] sm:$0xff] }
 0x167   :  { %v1247_v62 = vadd.f32 %v3255_v23, %v627_v22  ;;  %1651 = vmatpush.bf16.msra.mxu3 %v1528_v12  ;;  %v3260_v22 = vld [vmem:[#allocation22_spill] sm:$0xff] }
 0x168   :  { %v1371_v33 = vmax.f32 %v1250_v21, 0.0  ;;  %v1319_v21 = vmax.f32 %v3259_v57, 0.0  ;;  %v1085_v29 = vadd.f32 %v1084_v25, %v3260_v22  ;;  %v3261_v23 = vld [vmem:[#allocation26_spill] sm:$0xff]  ;;  %v1823_v25 = vld [vmem:[%s3151_s3 + $0x8] sm:$0xf] }
 0x169   :  { %v1370_v61 = vmax.f32 %v1247_v62, 0.0 }
 0x16a   :  { %v1467_v48 = vmin.f32 %v1371_v33, 6.0  ;;  %v3262_v33 = vld [vmem:[#allocation23_spill] sm:$0xff] }
 0x16b   :  { %v1466_v7 = vmin.f32 %v1370_v61, 6.0  ;;  %v1082_v61 = vadd.f32 %v1081_v20, %v3262_v33  ;;  %v1841_v20 = vld [vmem:[%s3151_s3 + $0x1c] sm:$0xf0] }
 0x16c   :  { %v1087_v58 = vpop.f32.mrf.mxu0 }
 0x16d   :  { %v1527_v18 = vpack.c.bf16 %v1467_v48, %v1466_v7  ;;  %v617_v38 = vpop.permute.xlu1 %616  ;;  %v1088_v63 = vadd.f32 %v1087_v58, %v3258_v27  ;;  %v1415_v48 = vmin.f32 %v1319_v21, 6.0  ;;  %v3263_v7 = vld [vmem:[#allocation8_spill] sm:$0xff]  ;;  %v3264_v58 = vld [vmem:[#allocation18_spill] sm:$0xff] }
 0x16e   :  { %v1241_v2 = vadd.f32 %v3257_v55, %v617_v38  ;;  %v1316_v38 = vmax.f32 %v1085_v29, 0.0  ;;  %v1076_v55 = vadd.f32 %v3021_v44, %v3264_v58  ;;  %v1838_v29 = vld [vmem:[%s3151_s3 + $0xc] sm:$0xf]  ;;  %v542_v8 = vpop.permute.xlu0 %541 }
 0x16f   :  { %1652 = vmatpush.bf16.msra.mxu3 %v1527_v18  ;;  %v1317_v16 = vmax.f32 %v1088_v63, 0.0  ;;  %v1079_v18 = vadd.f32 %v3030_v24, %v3263_v7  ;;  %v1196_v40 = vadd.f32 %v3266_v9, %v542_v8 }
 0x170   :  { %v1368_v6 = vmax.f32 %v1241_v2, 0.0  ;;  %v1315_v2 = vmax.f32 %v1082_v61, 0.0  ;;  %v1412_v63 = vmin.f32 %v1316_v38, 6.0 }
 0x171   :  { %v1314_v24 = vmax.f32 %v1079_v18, 0.0  ;;  %v1353_v30 = vmax.f32 %v1196_v40, 0.0 }
 0x172   :  { %v1464_v11 = vmin.f32 %v1368_v6, 6.0  ;;  %v1413_v6 = vmin.f32 %v1317_v16, 6.0  ;;  %v1411_v44 = vmin.f32 %v1315_v2, 6.0 }
 0x173   :  { %v1410_v22 = vmin.f32 %v1314_v24, 6.0  ;;  %v1449_v10 = vmin.f32 %v1353_v30, 6.0 }
 0x174   :  { %v1526_v51 = vpack.c.bf16 %v1465_v15, %v1464_v11  ;;  %v1090_v12 = vpop.f32.mrf.mxu0  ;;  %v3265_v11 = vld [vmem:[#allocation19_spill] sm:$0xff]  ;;  %v1500_v57 = vpack.c.bf16 %v1413_v6, %v1412_v63 }
 0x175   :  { %v1091_v62 = vadd.f32 %v1090_v12, %v3261_v23  ;;  %v1073_v27 = vadd.f32 %v3013_v13, %v3265_v11  ;;  %v1313_v12 = vmax.f32 %v1076_v55, 0.0  ;;  %v1825_v23 = vld [vmem:[%s3151_s3 + $0x20] sm:$0xf0]  ;;  %v1544_v60 = vpop.permute.xlu1 %1543 }
 0x176   :  { %1653 = vmatpush.bf16.msra.mxu3 %v1526_v51  ;;  %v1824_v51 = vor.u32 %v1841_v20, %v1823_v25  ;;  %v1828_v33 = vor.u32 %v1838_v29, %v1825_v23 }
 0x177   :  { %v1318_v46 = vmax.f32 %v1091_v62, 0.0  ;;  %v1312_v21 = vmax.f32 %v1073_v27, 0.0  ;;  %v1409_v13 = vmin.f32 %v1313_v12, 6.0  ;;  %v1499_v62 = vpack.c.bf16 %v1411_v44, %v1410_v22 }
 0x178   :  { %1612 = vmatmul.bf16.vlgmr.msrb.gmra.mxu3 %v1824_v51  ;;  %1626 = vmatmul.bf16.vlgmr.msra.gmra.mxu1 %v1828_v33 }
 0x179   :  { %v1414_v36 = vmin.f32 %v1318_v46, 6.0  ;;  %v1408_v61 = vmin.f32 %v1312_v21, 6.0  ;;  %v1839_v46 = vld [vmem:[%s3151_s3 + $0x14] sm:$0xf] }
 0x17b   :  { %v1501_v15 = vpack.c.bf16 %v1415_v48, %v1414_v36  ;;  %v1498_v16 = vpack.c.bf16 %v1409_v13, %v1408_v61  ;;  %v1833_v48 = vld [vmem:[%s3151_s3 + $0x28] sm:$0xf0] }
 0x17c   :  { %v1836_v7 = vor.u32 %v1839_v46, %v1833_v48 }
 0x17d   :  { %1590 = vmatpush.bf16.msrb.mxu2 %v1501_v15 }
 0x181   :  { %1591 = vmatpush.bf16.msrb.mxu2 %v1500_v57 }
 0x185   :  { %1592 = vmatpush.bf16.msrb.mxu2 %v1499_v62 }
 0x188   :  { %1654 = vmatmul.bf16.vlgmr.msra.gmra.mxu3 %v1836_v7 }
 0x189   :  { %1593 = vmatpush.bf16.msrb.mxu2 %v1498_v16 }
 0x18d   :  { %1594 = vmatpush.bf16.msrb.mxu2 %v1497_v45 }
 0x191   :  { %1595 = vmatpush.bf16.msrb.mxu2 %v1496_v52 }
 0x195   :  { %1596 = vmatpush.bf16.msrb.mxu2 %v1495_v37 }
 0x199   :  { %1597 = vmatpush.bf16.msrb.mxu2 %v1494_v3  ;;  %v3267_v3 = vld [vmem:[#allocation33_spill] sm:$0xff] }
 0x19a   :  { %v1193_v54 = vadd.f32 %v3267_v3, %v3048_v43  ;;  %v1660_v43 = vlaneseq }
 0x19c   :  { %1598 = vmatmul.bf16.vlgmr.msrb.gmra.mxu2 %v1820_v5  ;;  %v1661_v38 = vshrl.u32 %v1660_v43, 7 }
 0x19d   :  { %1632 = vmatpush.bf16.msra.mxu2 %v1525_v31  ;;  %v1352_v31 = vmax.f32 %v1193_v54, 0.0 }
 0x19e   :  { %v1662_v6 = vadd.s32 8, %v1661_v38  ;;  %vm1699_vm3 = vcmp.lt.s32.totalorder %v1661_v38, 4 }
 0x19f   :  { %v1448_v37 = vmin.f32 %v1352_v31, 6.0 }
 0x1a0   :  { %vm1704_vm1 = vcmp.eq.s32.totalorder %v1662_v6, 8 }
 0x1a1   :  { %1633 = vmatpush.bf16.msra.mxu2 %v1524_v50  ;;  %v1518_v52 = vpack.c.bf16 %v1449_v10, %v1448_v37  ;;  %v1585_v4 = vpop.f32.mrf.mxu1  ;;  %v1539_v50 = vpop.permute.xlu0 %1538 }
 0x1a2   :  { %v1586_v26 = vadd.f32 %v1585_v4, %v1539_v50 }
 0x1a5   :  { %1634 = vmatpush.bf16.msra.mxu2 %v1523_v19  ;;  %v1832_v19 = vor.u32 %v1842_v59, %v1831_v35 }
 0x1a9   :  { %1635 = vmatpush.bf16.msra.mxu2 %v1522_v14  ;;  %v1587_v39 = vpop.f32.mrf.mxu1 }
 0x1aa   :  { %v1588_v32 = vadd.f32 %v1587_v39, %v1544_v60 }
 0x1ad   :  { %1636 = vmatpush.bf16.msra.mxu2 %v1521_v53 }
 0x1b1   :  { %1637 = vmatpush.bf16.msra.mxu2 %v1520_v0 }
 0x1b5   :  { %1638 = vmatpush.bf16.msra.mxu2 %v1519_v28 }
 0x1b9   :  { %1639 = vmatpush.bf16.msra.mxu2 %v1518_v52 }
 0x1bc   :  { %1640 = vmatmul.bf16.vlgmr.msra.gmra.mxu2 %v1832_v19 }
 0x1f5   :  { %v1627_v47 = vpop.f32.mrf.mxu1 }
 0x1fb   :  { %v1613_v34 = vpop.f32.mrf.mxu3 }
 0x1fd   :  { %v1629_v55 = vpop.f32.mrf.mxu1 }
 0x203   :  { %v1615_v56 = vpop.f32.mrf.mxu3 }
 0x20b   :  { %v1655_v28 = vpop.f32.mrf.mxu3 }
 0x213   :  { %v1657_v24 = vpop.f32.mrf.mxu3 }
 0x21f   :  { %v1599_v1 = vpop.f32.mrf.mxu2 }
 0x220   :  { %v1600_v45 = vadd.f32 %v1599_v1, %v1586_v26 }
 0x222   :  { %v1614_v53 = vadd.f32 %v1613_v34, %v1600_v45 }
 0x224   :  { %v1628_v0 = vadd.f32 %v1627_v47, %v1614_v53 }
 0x227   :  { %v1601_v14 = vpop.f32.mrf.mxu2 }
 0x228   :  { %v1602_v17 = vadd.f32 %v1601_v14, %v1588_v32 }
 0x22a   :  { %v1616_v36 = vadd.f32 %v1615_v56, %v1602_v17 }
 0x22c   :  { %v1630_v15 = vadd.f32 %v1629_v55, %v1616_v36 }
 0x23f   :  { %v1641_v41 = vpop.f32.mrf.mxu2 }
 0x240   :  { %v1642_v18 = vadd.f32 %v1641_v41, %v1628_v0 }
 0x242   :  { %v1656_v58 = vadd.f32 %v1655_v28, %v1642_v18 }
 0x244   :  { %v1669_v2 = vand.u32 2147483647, %v1656_v58  ;;  %v1667_v62 = vmax.f32 %v1656_v58, 0.0 }
 0x246   :  { %v1671_v25 = vsub.f32 0.0, %v1669_v2 }
 0x247   :  { %v1643_v20 = vpop.f32.mrf.mxu2 }
 0x248   :  { %v1673_v11 = vmul.f32 1.442695, %v1671_v25  ;;  %v1644_v27 = vadd.f32 %v1643_v20, %v1630_v15 }
 0x24a   :  { %1853 = vpow2.f32 %v1673_v11  ;;  %v1658_v63 = vadd.f32 %v1657_v24, %v1644_v27 }
 0x24c   :  { %v1706_v51 = vsel %vm1704_vm1, %v1658_v63, 0.0 }
 0x24d   :  { %1712 = vst [vmem:[%s3152_s5 + $0x8] sm:$0xff] %v1706_v51 }
 0x250   :  { %v1854_v12 = vpop.eup %1853 }
 0x251   :  { %v1677_v44 = vadd.f32 1.0, %v1854_v12  ;;  %v1680_v57 = vmul.f32 -0.5, %v1854_v12  ;;  %v1683_v22 = vand.u32 2147483647, %v1854_v12 }
 0x253   :  { %1855 = vlog2.f32 %v1677_v44  ;;  %v1681_v21 = vadd.f32 1.0, %v1680_v57  ;;  %vm1684_vm2 = vcmp.lt.f32.partialorder %v1683_v22, 0.0004427343 }
 0x254   :  { %1857 = vtanh.f32 %v1656_v58 }
 0x255   :  { %v1682_v13 = vmul.f32 %v1854_v12, %v1681_v21 }
 0x259   :  { %v1856_v29 = vpop.eup %1855 }
 0x25a   :  { %v1679_v23 = vmul.f32 0.6931472, %v1856_v29  ;;  %v1858_v33 = vpop.eup %1857 }
 0x25b   :  { %v1665_v46 = vmul.f32 2.0, %v1858_v33 }
 0x25c   :  { %v1685_v61 = vsel %vm1684_vm2, %v1682_v13, %v1679_v23 }
 0x25d   :  { %v1695_v16 = vadd.f32 %v1685_v61, %v1667_v62 }
 0x25f   :  { %v1697_v48 = vadd.f32 0.001, %v1695_v16 }
 0x261   :  { %v1709_v7 = vsel %vm1699_vm3, %v1665_v46, %v1697_v48 }
 0x262   :  { %1711 = vst [vmem:[%s3152_s5] sm:$0xff] %v1709_v7 }

</bundles_post_ra>
